<compile_context>
chip_gen: v7x
topology: tpu7x:2x2x1
jax: 0.10.0
libtpu: 0.0.40
codegen_flags: <defaults>
</compile_context>

<pallas_src>
import functools

import jax
import jax.numpy as jnp
import numpy as np
from jax.experimental import pallas as pl
from jax.experimental.pallas import tpu as pltpu

NUM_RATE = 10
NUM_GENRE = 27
NUM_DIRECTOR = 5078
NUM_DIRECTOR_PAD = 5120          # 40 * 128: lane-aligned director width
EMB_DIM = 32
OUT_DIM = 3 * EMB_DIM            # 96
OUT_DIM_PAD = 128                # lane-dense output block width


def _round_up(x, m):
    return (x + m - 1) // m * m


def item_kernel(rate_last_ref, genre_ref, director_ref,
                e_rate_ref, w_genre_ref, w_dir_ref, out_ref):
    tb = genre_ref.shape[0]

    # --- rate: one-hot(last idx) @ (10, 32) f32 table on the MXU -> exact lookup ---
    rate_last = rate_last_ref[...]                                        # (tb, 1) int32
    iota = jax.lax.broadcasted_iota(jnp.int32, (tb, NUM_RATE), 1)         # (tb, 10)
    onehot = (rate_last == iota).astype(jnp.float32)
    rate_emb = jnp.dot(onehot, e_rate_ref[...],
                       preferred_element_type=jnp.float32)                # (tb, 32)

    # --- genre: int8 0/1 -> bf16, (tb,27)@(27,33) bf16 MXU; col 32 = ones -> row sum ---
    g = genre_ref[...].astype(jnp.bfloat16)
    g_out = jnp.dot(g, w_genre_ref[...], preferred_element_type=jnp.float32)  # (tb, 33)
    g_inv = pl.reciprocal(g_out[:, EMB_DIM:EMB_DIM + 1], approx=True)         # (tb, 1)
    genre_emb = g_out[:, :EMB_DIM] * g_inv

    # --- director: int8 0/1 -> bf16, (tb,5120)@(5120,33); col 32 = ones -> row sum ---
    d = director_ref[...].astype(jnp.bfloat16)
    d_out = jnp.dot(d, w_dir_ref[...], preferred_element_type=jnp.float32)    # (tb, 33)
    d_inv = pl.reciprocal(d_out[:, EMB_DIM:EMB_DIM + 1], approx=True)
    dir_emb = d_out[:, :EMB_DIM] * d_inv

    # single unmasked full-width store (lane-dense 128-wide block)
    out_ref[...] = jnp.concatenate(
        [rate_emb, genre_emb, dir_emb,
         jnp.zeros((tb, OUT_DIM_PAD - OUT_DIM), jnp.float32)], axis=1)


def prepare_item_params(e_rate, w_genre_t, w_dir_t):
    """Hoisted out of the per-call forward: build bf16 augmented weights once.

    The appended all-ones column folds the per-row multi-hot sum into the matmul;
    1.0 is exact in bf16 so the normalization denominator stays exact.
    """
    w_genre_aug = jnp.concatenate(
        [w_genre_t.astype(jnp.float32), jnp.ones((NUM_GENRE, 1), jnp.float32)],
        axis=1).astype(jnp.bfloat16)                                      # (27, 33)
    w_dir_pad = jnp.pad(w_dir_t.astype(jnp.float32),
                        ((0, NUM_DIRECTOR_PAD - NUM_DIRECTOR), (0, 0)))   # zero rows
    w_dir_aug = jnp.concatenate(
        [w_dir_pad, jnp.ones((NUM_DIRECTOR_PAD, 1), jnp.float32)],
        axis=1).astype(jnp.bfloat16)                                      # (5120, 33)
    return e_rate.astype(jnp.float32), w_genre_aug, w_dir_aug


@functools.partial(jax.jit, static_argnames=("tb_max",))
def item_forward(rate_idx, genre_idx, director_idx,
                 e_rate, w_genre_aug, w_dir_aug, *, tb_max=512):
    """rate_idx: (B, L) int; genre_idx: (B, 27); director_idx: (B, 5078).

    tb_max=512 is safe on all generations (well under v7x's 64 MiB VMEM with the
    48 MiB scoped limit below); raise to 1024-2048 on v5e/v6e (128 MiB VMEM) together
    with a larger vmem_limit_bytes if desired.
    """
    B = rate_idx.shape[0]

    # Only the last rate index is used; ship as (B, 1) int32.
    rate_last = rate_idx[:, -1:].astype(jnp.int32)
    # Multi-hot 0/1 indicators: int8 on the wire (kernel is HBM-read-bound on these).
    genre = genre_idx.astype(jnp.int8)
    director = director_idx.astype(jnp.int8)

    # Batch tile: bounded padding waste, multiple of 32 (int8 sublane tiling).
    n_tiles = pl.cdiv(B, tb_max)
    tb = _round_up(pl.cdiv(B, n_tiles), 32)
    padded_b = _round_up(B, tb)
    pad_b = padded_b - B

    rate_last = jnp.pad(rate_last, ((0, pad_b), (0, 0)))
    genre = jnp.pad(genre, ((0, pad_b), (0, 0)))
    # Column padding 5078 -> 5120 fuses with the int8 cast (one pass over the data).
    director = jnp.pad(director,
                       ((0, pad_b), (0, NUM_DIRECTOR_PAD - NUM_DIRECTOR)))
    # Padded rows produce 0 * (1/0) = nan; they are sliced away below.

    grid = (padded_b // tb,)
    out = pl.pallas_call(
        item_kernel,
        out_shape=jax.ShapeDtypeStruct((padded_b, OUT_DIM_PAD), jnp.float32),
        grid=grid,
        in_specs=[
            pl.BlockSpec((tb, 1), lambda i: (i, 0)),                    # last rate idx
            pl.BlockSpec((tb, NUM_GENRE), lambda i: (i, 0)),            # genre int8
            pl.BlockSpec((tb, NUM_DIRECTOR_PAD), lambda i: (i, 0)),     # director int8
            pl.BlockSpec((NUM_RATE, EMB_DIM), lambda i: (0, 0)),        # rate table (f32)
            pl.BlockSpec((NUM_GENRE, EMB_DIM + 1), lambda i: (0, 0)),   # genre W (bf16)
            pl.BlockSpec((NUM_DIRECTOR_PAD, EMB_DIM + 1), lambda i: (0, 0)),  # dir W
        ],
        out_specs=pl.BlockSpec((tb, OUT_DIM_PAD), lambda i: (i, 0)),
        compiler_params=pltpu.CompilerParams(
            dimension_semantics=("parallel",),          # megacore sharding on v7x
            vmem_limit_bytes=48 * 1024 * 1024,
        ),
    )(rate_last, genre, director, e_rate, w_genre_aug, w_dir_aug)
    return out[:B, :OUT_DIM]


def init_params(key):
    k1, k2, k3 = jax.random.split(key, 3)
    # torch.nn.Embedding default: N(0, 1)
    e_rate = jax.random.normal(k1, (NUM_RATE, EMB_DIM), jnp.float32)
    # torch.nn.Linear default: U(-1/sqrt(in), 1/sqrt(in)); stored transposed (in, out)
    w_genre_t = jax.random.uniform(k2, (NUM_GENRE, EMB_DIM), jnp.float32,
                                   -1.0 / np.sqrt(NUM_GENRE), 1.0 / np.sqrt(NUM_GENRE))
    w_dir_t = jax.random.uniform(k3, (NUM_DIRECTOR, EMB_DIM), jnp.float32,
                                 -1.0 / np.sqrt(NUM_DIRECTOR), 1.0 / np.sqrt(NUM_DIRECTOR))
    return e_rate, w_genre_t, w_dir_t


def reference_forward(rate_idx, genre_idx, director_idx, e_rate, w_genre_t, w_dir_t):
    rate_emb = e_rate[rate_idx][:, -1, :]
    g = genre_idx.astype(jnp.float32)
    d = director_idx.astype(jnp.float32)
    genre_emb = (g @ w_genre_t) / jnp.sum(g, axis=1, keepdims=True)
    dir_emb = (d @ w_dir_t) / jnp.sum(d, axis=1, keepdims=True)
    return jnp.concatenate([rate_emb, genre_emb, dir_emb], axis=1)


if __name__ == "__main__":
    key = jax.random.PRNGKey(0)
    kp, kr, kg, kd = jax.random.split(key, 4)

    B, L = 4, 3
    e_rate, w_genre_t, w_dir_t = init_params(kp)
    e_rate_p, w_genre_aug, w_dir_aug = prepare_item_params(e_rate, w_genre_t, w_dir_t)

    rate_idx = jax.random.randint(kr, (B, L), 0, NUM_RATE, jnp.int32)
    # multi-hot indicator inputs; force column 0 to 1 so row sums are nonzero
    genre_idx = (jax.random.uniform(kg, (B, NUM_GENRE)) < 0.3).astype(jnp.float32)
    genre_idx = genre_idx.at[:, 0].set(1.0)
    director_idx = (jax.random.uniform(kd, (B, NUM_DIRECTOR)) < 0.3).astype(jnp.float32)
    director_idx = director_idx.at[:, 0].set(1.0)

    out = item_forward(rate_idx, genre_idx, director_idx,
                       e_rate_p, w_genre_aug, w_dir_aug)
    out = jax.block_until_ready(out)

    ref = reference_forward(rate_idx, genre_idx, director_idx,
                            e_rate, w_genre_t, w_dir_t)
    ref = jax.block_until_ready(ref)

    assert out.shape == (B, OUT_DIM), out.shape
    # Tolerance deliberately widened for bf16 weights (~0.4% rounding on the Linear
    # weights) and the approximate EUP reciprocal; the rate lookup and the row-sum
    # normalization denominators remain exact.
    np.testing.assert_allclose(np.asarray(out), np.asarray(ref), rtol=2e-2, atol=1e-3)
    print("KERNEL_OK")
</pallas_src>

<mosaic_0001>
module attributes {stable_mosaic.version = 11 : i64} {
  func.func @item_kernel(%arg0: i32, %arg1: memref<32x1xi32, #tpu.memory_space<vmem>>, %arg2: memref<32x27xi8, #tpu.memory_space<vmem>>, %arg3: memref<32x5120xi8, #tpu.memory_space<vmem>>, %arg4: memref<10x32xf32, #tpu.memory_space<vmem>>, %arg5: memref<27x33xbf16, #tpu.memory_space<vmem>>, %arg6: memref<5120x33xbf16, #tpu.memory_space<vmem>>, %arg7: memref<32x128xf32, #tpu.memory_space<vmem>>) attributes {dimension_semantics = [#tpu.dimension_semantics<parallel>], iteration_bounds = array<i64: 1>, scalar_prefetch = 0 : i64, scratch_operands = 0 : i64, tpu.core_type = #tpu.core_type<tc>, window_params = [{transform_indices = @transform_0, window_bounds = array<i64: 32, 1>}, {transform_indices = @transform_1, window_bounds = array<i64: 32, 27>}, {transform_indices = @transform_2, window_bounds = array<i64: 32, 5120>}, {pipeline_mode = #tpu.pipeline_mode<synchronous>, transform_indices = @transform_3, window_bounds = array<i64: 10, 32>}, {pipeline_mode = #tpu.pipeline_mode<synchronous>, transform_indices = @transform_4, window_bounds = array<i64: 27, 33>}, {pipeline_mode = #tpu.pipeline_mode<synchronous>, transform_indices = @transform_5, window_bounds = array<i64: 5120, 33>}, {transform_indices = @transform_6, window_bounds = array<i64: 32, 128>}]} {
    %c0 = arith.constant 0 : index
    %c0_0 = arith.constant 0 : index
    %0 = vector.load %arg1[%c0, %c0_0] : memref<32x1xi32, #tpu.memory_space<vmem>>, vector<32x1xi32>
    %1 = tpu.iota {dimensions = array<i32: 1>} : vector<32x10xi32>
    %2 = vector.broadcast %0 : vector<32x1xi32> to vector<32x10xi32>
    %3 = arith.cmpi eq, %2, %1 : vector<32x10xi32>
    %4 = arith.extui %3 : vector<32x10xi1> to vector<32x10xi32>
    %5 = arith.sitofp %4 : vector<32x10xi32> to vector<32x10xf32>
    %c0_1 = arith.constant 0 : index
    %c0_2 = arith.constant 0 : index
    %6 = vector.load %arg4[%c0_1, %c0_2] : memref<10x32xf32, #tpu.memory_space<vmem>>, vector<10x32xf32>
    %cst = arith.constant dense<0.000000e+00> : vector<32x32xf32>
    %7 = tpu.matmul %5, %6, %cst {dimension_numbers = #tpu.dot_dimension_numbers<[1], [0], [0], [1], [0, 0, 1, 1], [], []>} : vector<32x10xf32>, vector<10x32xf32>, vector<32x32xf32> -> vector<32x32xf32>
    %c0_3 = arith.constant 0 : index
    %c0_4 = arith.constant 0 : index
    %8 = vector.load %arg2[%c0_3, %c0_4] : memref<32x27xi8, #tpu.memory_space<vmem>>, vector<32x27xi8>
    %9 = arith.sitofp %8 : vector<32x27xi8> to vector<32x27xbf16>
    %c0_5 = arith.constant 0 : index
    %c0_6 = arith.constant 0 : index
    %10 = vector.load %arg5[%c0_5, %c0_6] : memref<27x33xbf16, #tpu.memory_space<vmem>>, vector<27x33xbf16>
    %cst_7 = arith.constant dense<0.000000e+00> : vector<32x33xf32>
    %11 = tpu.matmul %9, %10, %cst_7 {dimension_numbers = #tpu.dot_dimension_numbers<[1], [0], [0], [1], [0, 0, 1, 1], [], []>} : vector<32x27xbf16>, vector<27x33xbf16>, vector<32x33xf32> -> vector<32x33xf32>
    %12 = vector.extract_strided_slice %11 {offsets = [0, 32], sizes = [32, 1], strides = [1, 1]} : vector<32x33xf32> to vector<32x1xf32>
    %13 = tpu.reciprocal %12 {approx = true} : vector<32x1xf32> -> vector<32x1xf32>
    %14 = vector.extract_strided_slice %11 {offsets = [0, 0], sizes = [32, 32], strides = [1, 1]} : vector<32x33xf32> to vector<32x32xf32>
    %15 = vector.broadcast %13 : vector<32x1xf32> to vector<32x32xf32>
    %16 = arith.mulf %14, %15 : vector<32x32xf32>
    %c0_8 = arith.constant 0 : index
    %c0_9 = arith.constant 0 : index
    %17 = vector.load %arg3[%c0_8, %c0_9] : memref<32x5120xi8, #tpu.memory_space<vmem>>, vector<32x5120xi8>
    %18 = arith.sitofp %17 : vector<32x5120xi8> to vector<32x5120xbf16>
    %c0_10 = arith.constant 0 : index
    %c0_11 = arith.constant 0 : index
    %19 = vector.load %arg6[%c0_10, %c0_11] : memref<5120x33xbf16, #tpu.memory_space<vmem>>, vector<5120x33xbf16>
    %cst_12 = arith.constant dense<0.000000e+00> : vector<32x33xf32>
    %20 = tpu.matmul %18, %19, %cst_12 {dimension_numbers = #tpu.dot_dimension_numbers<[1], [0], [0], [1], [0, 0, 1, 1], [], []>} : vector<32x5120xbf16>, vector<5120x33xbf16>, vector<32x33xf32> -> vector<32x33xf32>
    %21 = vector.extract_strided_slice %20 {offsets = [0, 32], sizes = [32, 1], strides = [1, 1]} : vector<32x33xf32> to vector<32x1xf32>
    %22 = tpu.reciprocal %21 {approx = true} : vector<32x1xf32> -> vector<32x1xf32>
    %23 = vector.extract_strided_slice %20 {offsets = [0, 0], sizes = [32, 32], strides = [1, 1]} : vector<32x33xf32> to vector<32x32xf32>
    %24 = vector.broadcast %22 : vector<32x1xf32> to vector<32x32xf32>
    %25 = arith.mulf %23, %24 : vector<32x32xf32>
    %cst_13 = arith.constant 0.000000e+00 : f32
    %26 = vector.broadcast %cst_13 : f32 to vector<32x32xf32>
    %27 = tpu.concatenate %7, %16, %25, %26 in 1 : vector<32x32xf32>, vector<32x32xf32>, vector<32x32xf32>, vector<32x32xf32> -> vector<32x128xf32>
    %c0_14 = arith.constant 0 : index
    %c0_15 = arith.constant 0 : index
    %28 = vector.load %arg7[%c0_14, %c0_15] : memref<32x128xf32, #tpu.memory_space<vmem>>, vector<32x128xf32>
    tpu.vector_store %arg7[%c0_14, %c0_15], %27 {strides = array<i32>} : memref<32x128xf32, #tpu.memory_space<vmem>>, vector<32x128xf32>,
    return
  }
  func.func @transform_0(%arg0: i32) -> (i32, i32) {
    %c0_i32 = arith.constant 0 : i32
    %c0_i32_0 = arith.constant 0 : i32
    return %arg0, %c0_i32 : i32, i32
  }
  func.func @transform_1(%arg0: i32) -> (i32, i32) {
    %c0_i32 = arith.constant 0 : i32
    %c0_i32_0 = arith.constant 0 : i32
    return %arg0, %c0_i32 : i32, i32
  }
  func.func @transform_2(%arg0: i32) -> (i32, i32) {
    %c0_i32 = arith.constant 0 : i32
    %c0_i32_0 = arith.constant 0 : i32
    return %arg0, %c0_i32 : i32, i32
  }
  func.func @transform_3(%arg0: i32) -> (i32, i32) {
    %c0_i32 = arith.constant 0 : i32
    %c0_i32_0 = arith.constant 0 : i32
    %c0_i32_1 = arith.constant 0 : i32
    return %c0_i32, %c0_i32_0 : i32, i32
  }
  func.func @transform_4(%arg0: i32) -> (i32, i32) {
    %c0_i32 = arith.constant 0 : i32
    %c0_i32_0 = arith.constant 0 : i32
    %c0_i32_1 = arith.constant 0 : i32
    return %c0_i32, %c0_i32_0 : i32, i32
  }
  func.func @transform_5(%arg0: i32) -> (i32, i32) {
    %c0_i32 = arith.constant 0 : i32
    %c0_i32_0 = arith.constant 0 : i32
    %c0_i32_1 = arith.constant 0 : i32
    return %c0_i32, %c0_i32_0 : i32, i32
  }
  func.func @transform_6(%arg0: i32) -> (i32, i32) {
    %c0_i32 = arith.constant 0 : i32
    %c0_i32_0 = arith.constant 0 : i32
    return %arg0, %c0_i32 : i32, i32
  }
}

</mosaic_0001>

<bundles_post_ra>
// kernel: item_forward.1
= control target key start
LH: loop header
LB: loop body
LE: loop exit
PB: predicated region body
PF: predicated region fallthrough
CT: control target
= control target key end

     0   :  { %vm183_vm0 = vcmask 1044480   ;;  %vm184_vm1 = vcmask 1045504   ;;  %v5286_v0 = vmov 0   ;;  %v5287_v2 = vmov 65535   ;;  %s6671_s0 = inlined_call_operand.vmem [shape: s32[32,1], index: 0, kind: input, shape index: {}]   ;;  %s6672_s4 = inlined_call_operand.vmem [shape: bf16[27,33], index: 4, kind: input, shape index: {}]   ;;  %s6673_s1 = inlined_call_operand.vmem [shape: s8[32,27], index: 1, kind: input, shape index: {}]   ;;  %s6674_s3 = inlined_call_operand.vmem [shape: f32[10,32], index: 3, kind: input, shape index: {}]   ;;  %s6675_s5 = inlined_call_operand.vmem [shape: bf16[5120,33], index: 5, kind: input, shape index: {}]   ;;  %s6676_s2 = inlined_call_operand.vmem [shape: s8[32,5120], index: 2, kind: input, shape index: {}]   ;;  %s6677_s6 = inlined_call_operand.vmem [shape: f32[32,128], index: 6, kind: output, shape index: {}]  }
   0x1   :  { %4944 = vset.pattern.permute.xlu0 %v5286_v0  ;;  %v24_v1 = vld [vmem:[%s6671_s0] sm:$0xff]  ;;  %v185_v3 = vsel %vm183_vm0, 4294967295, %v5287_v2  ;;  %4945 = vset.pattern.permute.xlu1 %v5286_v0  ;;  %v25_v5 = vld [vmem:[%s6671_s0 + $0x8] sm:$0xff]  ;;  %vm176_vm2 = vcmask 220160   ;;  %v26_v10 = vld [vmem:[%s6671_s0 + $0x10] sm:$0xff]  ;;  %vm69_vm3 = vcmask 1041408  }
   0x2   :  { %31 = vperm.xlu0 %4944, %v24_v1   ;;  %v4948_v4 = vld [vmem:[%s6672_s4] sm:$0xff]   ;;  %v186_v6 = vsel %vm184_vm1, %v185_v3, 0  ;;  %v4949_v7 = vld [vmem:[%s6672_s4 + $0x8] sm:$0x3f]   ;;  %v27_v11 = vld [vmem:[%s6671_s0 + $0x18] sm:$0xff]  ;;  %37 = vperm.xlu1 %4945, %v26_v10   ;;  %vm5288_vm4 = vmmov 1  }
   0x3   :  { %v158_v8 = vld [vmem:[%s6673_s1] sm:$0xff]  ;;  %4923 = vmatprep.subr.bf16.mxu1 %v4948_v4  ;;  %v188_v13 = vand.u32 %v4949_v7, %v186_v6  ;;  %v55_v14 = vld [vmem:[%s6674_s3 + $0x8] sm:$0x3]  ;;  %vm4932_vm5 = vmpackc.low %vm69_vm3, %vm5288_vm4  ;;  %vm56_vm6 = vcmask 80896   ;;  %vm3987_vm11 = vcmask 261120   ;;  %vm3992_vm12 = vcmask 523264  }
   0x4   :  { %v159_v9 = vunpack.c.l.s8.bf16 %v158_v8  ;;  %v54_v12 = vld [vmem:[%s6674_s3] sm:$0xff]  ;;  %4924 = vmatpush3.bf16.msra.mxu1 %v4948_v4  ;;  %v160_v18 = vunpack.c.h.s8.bf16 %v158_v8  ;;  %v4954_v20 = vld [vmem:[%s6675_s5 + $0xc8] sm:$0xff]   ;;  %v4958_v22 = vld [vmem:[%s6675_s5 + $0xd0] sm:$0xff]   ;;  %vm3997_vm13 = vcmask 785408  }
   0x5   :  { %v4931_v15 = vpack.c.bf16 %v55_v14, %v54_v12  ;;  %v4950_v16 = vld [vmem:[%s6675_s5 + $0xc0] sm:$0xff]   ;;  %4925 = vmatprep.subr.bf16.mxu1 %v188_v13  ;;  %v4956_v21 = vld [vmem:[%s6675_s5 + $0x88] sm:$0xff]   ;;  %v4960_v23 = vld [vmem:[%s6675_s5 + $0x90] sm:$0xff]  }
   0x6   :  { %34 = vperm.xlu0 %4944, %v25_v5   ;;  %4927 = vmatprep.mubr.msk.bf16.mxu1 %vm176_vm2, %v159_v9  ;;  %v4951_v17 = vld [vmem:[%s6675_s5 + $0x40] sm:$0xff]   ;;  %v4962_v24 = vld [vmem:[%s6675_s5 + $0xd8] sm:$0xff]   ;;  %v4970_v28 = vld [vmem:[%s6675_s5 + $0xe8] sm:$0xff]  }
   0x7   :  { %4933 = vmatprep.subr.msk.bf16.mxu0 %vm4932_vm5, %v4931_v15  ;;  %40 = vperm.xlu1 %4945, %v27_v11   ;;  %v4952_v19 = vld [vmem:[%s6675_s5 + $0x80] sm:$0xff]   ;;  %v4964_v25 = vld [vmem:[%s6675_s5 + $0x98] sm:$0xff]   ;;  %v4972_v29 = vld [vmem:[%s6675_s5 + $0xa8] sm:$0xff]  }
   0x8   :  { %4926 = vmatpush3.bf16.msra.mxu1 %v188_v13  ;;  %4936 = vmatpush3.bf16.msk.msra.mxu0 %vm4932_vm5, %v4931_v15  ;;  %v4966_v26 = vld [vmem:[%s6675_s5 + $0xe0] sm:$0xff]   ;;  %v4974_v30 = vld [vmem:[%s6675_s5 + $0xf0] sm:$0xff]   ;;  %v4978_v32 = vld [vmem:[%s6675_s5 + $0xf8] sm:$0xff]  }
   0x9   :  { %4381 = vmatprep.subr.bf16.mxu1 %v4950_v16  ;;  %4353 = vmatprep.subr.bf16.mxu0 %v4951_v17  ;;  %v4968_v27 = vld [vmem:[%s6675_s5 + $0xa0] sm:$0xff]   ;;  %v4976_v31 = vld [vmem:[%s6675_s5 + $0xb0] sm:$0xff]   ;;  %v4980_v33 = vld [vmem:[%s6675_s5 + $0xb8] sm:$0xff]  }
   0xa   :  { %v270_v34 = vld [vmem:[%s6676_s2 + $0x18] sm:$0xff]  ;;  %v4982_v36 = vld [vmem:[%s6675_s5 + $0x1c0] sm:$0xff]   ;;  %v269_v37 = vld [vmem:[%s6676_s2 + $0x10] sm:$0xff] }
   0xb   :  { %4928 = vmatmul.mubr.msk.bf16.vlgmr.msra.gmra.mrb[0].mxu1 %vm176_vm2, %v160_v18  ;;  %v310_v35 = vunpack.c.l.s8.bf16 %v270_v34  ;;  %v309_v38 = vunpack.c.l.s8.bf16 %v269_v37  ;;  %v4984_v39 = vld [vmem:[%s6675_s5 + $0x180] sm:$0xff]   ;;  %v4986_v40 = vld [vmem:[%s6675_s5 + $0x1c8] sm:$0xff]   ;;  %v4990_v42 = vld [vmem:[%s6675_s5 + $0x1d0] sm:$0xff]   ;;  %v350_v48 = vunpack.c.h.s8.bf16 %v270_v34  ;;  %v349_v50 = vunpack.c.h.s8.bf16 %v269_v37 }
   0xc   :  { %4382 = vmatpush3.bf16.msra.mxu1 %v4952_v19  ;;  %v4988_v41 = vld [vmem:[%s6675_s5 + $0x188] sm:$0xff]   ;;  %v4992_v43 = vld [vmem:[%s6675_s5 + $0x190] sm:$0xff]   ;;  %v4994_v44 = vld [vmem:[%s6675_s5 + $0x1d8] sm:$0xff]   ;;  %v5289_v18 = vmov 32   ;;  %v5290_v37 = vmov 0.0  }
   0xd   :  { %4383 = vmatprep.subr.bf16.mxu1 %v4954_v20  ;;  %3028 = vmatprep.mubr.bf16.mxu1 %v310_v35  ;;  %v4996_v45 = vld [vmem:[%s6675_s5 + $0x198] sm:$0xff]   ;;  %v4998_v46 = vld [vmem:[%s6675_s5 + $0x1e0] sm:$0xff]   ;;  %v5002_v49 = vld [vmem:[%s6675_s5 + $0x1e8] sm:$0xff]  }
   0xe   :  { %v5000_v47 = vld [vmem:[%s6675_s5 + $0x1a0] sm:$0xff]   ;;  %v5004_v51 = vld [vmem:[%s6675_s5 + $0x1a8] sm:$0xff]   ;;  %v5006_v52 = vld [vmem:[%s6675_s5 + $0x1f0] sm:$0xff]   ;;  %4946 = vset.pattern.permute.xlu1 %v5289_v18  ;;  %4947 = vset.pattern.permute.xlu0 %v5289_v18 }
   0xf   :  { %v5008_v53 = vld [vmem:[%s6675_s5 + $0x1b0] sm:$0xff]   ;;  %v5010_v54 = vld [vmem:[%s6675_s5 + $0x1f8] sm:$0xff]   ;;  %v5014_v58 = vld [vmem:[%s6675_s5 + $0x2c0] sm:$0xff]  }
  0x10   :  { %4384 = vmatpush3.bf16.msra.mxu1 %v4956_v21  ;;  %v5012_v55 = vld [vmem:[%s6675_s5 + $0x1b8] sm:$0xff]   ;;  %v273_v59 = vld [vmem:[%s6676_s2 + $0x30] sm:$0xff]  ;;  %v5016_v61 = vld [vmem:[%s6675_s5 + $0x280] sm:$0xff]  }
  0x11   :  { %4385 = vmatprep.subr.bf16.mxu1 %v4958_v22  ;;  %v274_v56 = vld [vmem:[%s6676_s2 + $0x38] sm:$0xff]  ;;  %v313_v60 = vunpack.c.l.s8.bf16 %v273_v59  ;;  %v5018_v62 = vld [vmem:[%s6675_s5 + $0x2c8] sm:$0xff]   ;;  %v353_v1 = vunpack.c.h.s8.bf16 %v273_v59  ;;  %v5022_v2 = vld [vmem:[%s6675_s5 + $0x2d0] sm:$0xff]  }
  0x12   :  { %v314_v57 = vunpack.c.l.s8.bf16 %v274_v56  ;;  %v5020_v63 = vld [vmem:[%s6675_s5 + $0x288] sm:$0xff]   ;;  %v354_v0 = vunpack.c.h.s8.bf16 %v274_v56  ;;  %v5024_v3 = vld [vmem:[%s6675_s5 + $0x290] sm:$0xff]   ;;  %v5026_v4 = vld [vmem:[%s6675_s5 + $0x2d8] sm:$0xff]  }
  0x13   :  { %v5028_v5 = vld [vmem:[%s6675_s5 + $0x298] sm:$0xff]   ;;  %v5030_v6 = vld [vmem:[%s6675_s5 + $0x2e0] sm:$0xff]   ;;  %v5034_v8 = vld [vmem:[%s6675_s5 + $0x2e8] sm:$0xff]  }
  0x14   :  { %4386 = vmatpush3.bf16.msra.mxu1 %v4960_v23  ;;  %v5032_v7 = vld [vmem:[%s6675_s5 + $0x2a0] sm:$0xff]   ;;  %v5036_v9 = vld [vmem:[%s6675_s5 + $0x2a8] sm:$0xff]   ;;  %v5038_v10 = vld [vmem:[%s6675_s5 + $0x2f0] sm:$0xff]  }
  0x15   :  { %4387 = vmatprep.subr.bf16.mxu1 %v4962_v24  ;;  %v5040_v11 = vld [vmem:[%s6675_s5 + $0x2b0] sm:$0xff]   ;;  %v5042_v12 = vld [vmem:[%s6675_s5 + $0x2f8] sm:$0xff]   ;;  %v5046_v16 = vld [vmem:[%s6675_s5 + $0x3c0] sm:$0xff]  }
  0x16   :  { %v5044_v13 = vld [vmem:[%s6675_s5 + $0x2b8] sm:$0xff]   ;;  %v277_v17 = vld [vmem:[%s6676_s2 + $0x50] sm:$0xff]  ;;  %v5048_v20 = vld [vmem:[%s6675_s5 + $0x380] sm:$0xff]  }
  0x17   :  { %v278_v14 = vld [vmem:[%s6676_s2 + $0x58] sm:$0xff]  ;;  %v317_v19 = vunpack.c.l.s8.bf16 %v277_v17  ;;  %v5050_v21 = vld [vmem:[%s6675_s5 + $0x3c8] sm:$0xff]   ;;  %v357_v24 = vunpack.c.h.s8.bf16 %v277_v17  ;;  %v5078_v56 = vld [vmem:[%s6675_s5 + $0x4c0] sm:$0xff]  }
  0x18   :  { %4388 = vmatpush3.bf16.msra.mxu1 %v4964_v25  ;;  %v318_v15 = vunpack.c.l.s8.bf16 %v278_v14  ;;  %v5051_v22 = vld [vmem:[%s6675_s5 + $0x388] sm:$0xff]   ;;  %v358_v23 = vunpack.c.h.s8.bf16 %v278_v14  ;;  %v5054_v25 = vld [vmem:[%s6675_s5 + $0x3d0] sm:$0xff]   ;;  %v5096_v14 = vld [vmem:[%s6675_s5 + $0x4a0] sm:$0xff]  }
  0x19   :  { %4389 = vmatprep.subr.bf16.mxu1 %v4966_v26  ;;  %v5055_v26 = vld [vmem:[%s6675_s5 + $0x390] sm:$0xff]   ;;  %v5068_v34 = vld [vmem:[%s6675_s5 + $0x3a8] sm:$0xff]   ;;  %v267_v18 = vld [vmem:[%s6676_s2] sm:$0xff] }
  0x1a   :  { %v5098_v17 = vld [vmem:[%s6675_s5 + $0x4e8] sm:$0xff]  }
  0x1c   :  { %4390 = vmatpush3.bf16.msra.mxu1 %v4968_v27  ;;  %v5058_v27 = vld [vmem:[%s6675_s5 + $0x3d8] sm:$0xff]  }
  0x1d   :  { %4391 = vmatprep.subr.bf16.mxu1 %v4970_v28  ;;  %v5060_v28 = vld [vmem:[%s6675_s5 + $0x398] sm:$0xff]  }
  0x20   :  { %4392 = vmatpush3.bf16.msra.mxu1 %v4972_v29  ;;  %v28_v29 = vlaneseq }
  0x21   :  { %4393 = vmatprep.subr.bf16.mxu1 %v4974_v30  ;;  %v5062_v30 = vld [vmem:[%s6675_s5 + $0x3e0] sm:$0xff]  }
  0x24   :  { %4394 = vmatpush3.bf16.msra.mxu1 %v4976_v31  ;;  %v5064_v31 = vld [vmem:[%s6675_s5 + $0x3a0] sm:$0xff]  }
  0x25   :  { %4395 = vmatprep.subr.bf16.mxu1 %v4978_v32  ;;  %v29_v32 = vand.u32 127, %v28_v29  ;;  %v4991_v29 = vld [vmem:[%s6675_s5 + $0x150] sm:$0xff]  }
  0x28   :  { %4396 = vmatpush3.bf16.msra.mxu1 %v4980_v33  ;;  %v5066_v33 = vld [vmem:[%s6675_s5 + $0x3e8] sm:$0xff]  }
  0x29   :  { %4437 = vmatprep.subr.bf16.mxu1 %v4982_v36  ;;  %v5070_v36 = vld [vmem:[%s6675_s5 + $0x3f0] sm:$0xff]  }
  0x2b   :  { %3029 = vmatmul.mubr.bf16.vlgmr.msra.gmra.mrb[4].mxu1 %v309_v38 }
  0x2c   :  { %4438 = vmatpush3.bf16.msra.mxu1 %v4984_v39  ;;  %3036 = vmatprep.mubr.bf16.mxu1 %v350_v48  ;;  %v4953_v39 = vld [vmem:[%s6675_s5] sm:$0xff]  }
  0x2d   :  { %4439 = vmatprep.subr.bf16.mxu1 %v4986_v40  ;;  %v4955_v40 = vld [vmem:[%s6675_s5 + $0x48] sm:$0xff]  }
  0x30   :  { %4440 = vmatpush3.bf16.msra.mxu1 %v4988_v41 }
  0x31   :  { %4441 = vmatprep.subr.bf16.mxu1 %v4990_v42  ;;  %v5072_v42 = vld [vmem:[%s6675_s5 + $0x3b0] sm:$0xff]  }
  0x33   :  { %3037 = vmatmul.mubr.bf16.gmra.mrb[8].mxu1 %v349_v50  ;;  %v4957_v50 = vld [vmem:[%s6675_s5 + $0x8] sm:$0xff]  }
  0x34   :  { %4442 = vmatpush3.bf16.msra.mxu1 %v4992_v43  ;;  %3126 = vmatprep.mubr.bf16.mxu1 %v314_v57  ;;  %v281_v57 = vld [vmem:[%s6676_s2 + $0x70] sm:$0xff] }
  0x35   :  { %4443 = vmatprep.subr.bf16.mxu1 %v4994_v44  ;;  %v5574_v44 = vld [vmem:[%s6676_s2 + $0x8] sm:$0xff]  ;;  %v321_v59 = vunpack.c.l.s8.bf16 %v281_v57 }
  0x38   :  { %4444 = vmatpush3.bf16.msra.mxu1 %v4996_v45 }
  0x39   :  { %4445 = vmatprep.subr.bf16.mxu1 %v4998_v46  ;;  %v5074_v46 = vld [vmem:[%s6675_s5 + $0x3f8] sm:$0xff]  }
  0x3c   :  { %4446 = vmatpush3.bf16.msra.mxu1 %v5000_v47 }
  0x3d   :  { %4447 = vmatprep.subr.bf16.mxu1 %v5002_v49  ;;  %v5076_v49 = vld [vmem:[%s6675_s5 + $0x3b8] sm:$0xff]  }
  0x40   :  { %4448 = vmatpush3.bf16.msra.mxu1 %v5004_v51  ;;  %v4959_v51 = vld [vmem:[%s6675_s5 + $0x50] sm:$0xff]  }
  0x41   :  { %4449 = vmatprep.subr.bf16.mxu1 %v5006_v52  ;;  %v308_v52 = vunpack.c.l.s8.bf16 %v5574_v44 }
  0x44   :  { %4450 = vmatpush3.bf16.msra.mxu1 %v5008_v53 }
  0x45   :  { %4451 = vmatprep.subr.bf16.mxu1 %v5010_v54  ;;  %v282_v54 = vld [vmem:[%s6676_s2 + $0x78] sm:$0xff] }
  0x48   :  { %4452 = vmatpush3.bf16.msra.mxu1 %v5012_v55  ;;  %v322_v55 = vunpack.c.l.s8.bf16 %v282_v54 }
  0x49   :  { %4493 = vmatprep.subr.bf16.mxu1 %v5014_v58  ;;  %v4961_v58 = vld [vmem:[%s6675_s5 + $0x10] sm:$0xff]  }
  0x4b   :  { %3127 = vmatmul.mubr.bf16.vlgmr.msra.gmra.mrb[12].mxu1 %v313_v60  ;;  %v5080_v60 = vld [vmem:[%s6675_s5 + $0x480] sm:$0xff]  }
  0x4c   :  { %4494 = vmatpush3.bf16.msra.mxu1 %v5016_v61  ;;  %3134 = vmatprep.mubr.bf16.mxu1 %v354_v0  ;;  %v4963_v61 = vld [vmem:[%s6675_s5 + $0x58] sm:$0xff]  }
  0x4d   :  { %4495 = vmatprep.subr.bf16.mxu1 %v5018_v62  ;;  %v5082_v62 = vld [vmem:[%s6675_s5 + $0x4c8] sm:$0xff]   ;;  %v4965_v0 = vld [vmem:[%s6675_s5 + $0x18] sm:$0xff]  }
  0x50   :  { %4496 = vmatpush3.bf16.msra.mxu1 %v5020_v63  ;;  %v362_v63 = vunpack.c.h.s8.bf16 %v282_v54  ;;  %v5007_v54 = vld [vmem:[%s6675_s5 + $0x170] sm:$0xff]  }
  0x51   :  { %4497 = vmatprep.subr.bf16.mxu1 %v5022_v2  ;;  %v4967_v2 = vld [vmem:[%s6675_s5 + $0x60] sm:$0xff]  }
  0x53   :  { %3135 = vmatmul.mubr.bf16.gmra.mrb[16].mxu1 %v353_v1  ;;  %v5084_v1 = vld [vmem:[%s6675_s5 + $0x488] sm:$0xff]  }
  0x54   :  { %4498 = vmatpush3.bf16.msra.mxu1 %v5024_v3  ;;  %3224 = vmatprep.mubr.bf16.mxu1 %v318_v15  ;;  %v5086_v3 = vld [vmem:[%s6675_s5 + $0x4d0] sm:$0xff]   ;;  %v4979_v15 = vld [vmem:[%s6675_s5 + $0x78] sm:$0xff]  }
  0x55   :  { %4499 = vmatprep.subr.bf16.mxu1 %v5026_v4  ;;  %v361_v4 = vunpack.c.h.s8.bf16 %v281_v57  ;;  %v5126_v57 = vld [vmem:[%s6675_s5 + $0x5e0] sm:$0xff]  }
  0x58   :  { %4500 = vmatpush3.bf16.msra.mxu1 %v5028_v5  ;;  %v4969_v5 = vld [vmem:[%s6675_s5 + $0x20] sm:$0xff]  }
  0x59   :  { %4501 = vmatprep.subr.bf16.mxu1 %v5030_v6  ;;  %v5088_v6 = vld [vmem:[%s6675_s5 + $0x490] sm:$0xff]  }
  0x5c   :  { %4502 = vmatpush3.bf16.msra.mxu1 %v5032_v7  ;;  %v4971_v7 = vld [vmem:[%s6675_s5 + $0x68] sm:$0xff]  }
  0x5d   :  { %4503 = vmatprep.subr.bf16.mxu1 %v5034_v8  ;;  %v5090_v8 = vld [vmem:[%s6675_s5 + $0x4d8] sm:$0xff]  }
  0x60   :  { %4504 = vmatpush3.bf16.msra.mxu1 %v5036_v9  ;;  %v4973_v9 = vld [vmem:[%s6675_s5 + $0x28] sm:$0xff]  }
  0x61   :  { %4505 = vmatprep.subr.bf16.mxu1 %v5038_v10  ;;  %v5092_v10 = vld [vmem:[%s6675_s5 + $0x498] sm:$0xff]  }
  0x64   :  { %4506 = vmatpush3.bf16.msra.mxu1 %v5040_v11  ;;  %v4975_v11 = vld [vmem:[%s6675_s5 + $0x70] sm:$0xff]  }
  0x65   :  { %4507 = vmatprep.subr.bf16.mxu1 %v5042_v12  ;;  %v5094_v12 = vld [vmem:[%s6675_s5 + $0x4e0] sm:$0xff]  }
  0x68   :  { %4508 = vmatpush3.bf16.msra.mxu1 %v5044_v13  ;;  %v4977_v13 = vld [vmem:[%s6675_s5 + $0x30] sm:$0xff]  }
  0x69   :  { %4549 = vmatprep.subr.bf16.mxu1 %v5046_v16  ;;  %v4981_v16 = vld [vmem:[%s6675_s5 + $0x38] sm:$0xff]  }
  0x6b   :  { %3225 = vmatmul.mubr.bf16.vlgmr.msra.gmra.mrb[20].mxu1 %v317_v19  ;;  %v5100_v19 = vld [vmem:[%s6675_s5 + $0x4a8] sm:$0xff]  }
  0x6c   :  { %4550 = vmatpush3.bf16.msra.mxu1 %v5048_v20  ;;  %3232 = vmatprep.mubr.bf16.mxu1 %v358_v23  ;;  %v4983_v20 = vld [vmem:[%s6675_s5 + $0x140] sm:$0xff]  }
  0x6d   :  { %4551 = vmatprep.subr.bf16.mxu1 %v5050_v21  ;;  %v5102_v21 = vld [vmem:[%s6675_s5 + $0x4f0] sm:$0xff]   ;;  %v4985_v23 = vld [vmem:[%s6675_s5 + $0x100] sm:$0xff]  }
  0x70   :  { %4552 = vmatpush3.bf16.msra.mxu1 %v5051_v22  ;;  %v307_v22 = vunpack.c.l.s8.bf16 %v267_v18 }
  0x71   :  { %4553 = vmatprep.subr.bf16.mxu1 %v5054_v25  ;;  %v5104_v25 = vld [vmem:[%s6675_s5 + $0x4b0] sm:$0xff]  }
  0x73   :  { %3233 = vmatmul.mubr.bf16.gmra.mrb[24].mxu1 %v357_v24  ;;  %v348_v24 = vunpack.c.h.s8.bf16 %v5574_v44  ;;  %v5114_v44 = vld [vmem:[%s6675_s5 + $0x5c8] sm:$0xff]  }
  0x74   :  { %4554 = vmatpush3.bf16.msra.mxu1 %v5055_v26  ;;  %3322 = vmatprep.mubr.bf16.mxu1 %v322_v55  ;;  %v4987_v26 = vld [vmem:[%s6675_s5 + $0x148] sm:$0xff]   ;;  %v5124_v55 = vld [vmem:[%s6675_s5 + $0x598] sm:$0xff]  }
  0x75   :  { %4555 = vmatprep.subr.bf16.mxu1 %v5058_v27  ;;  %v4989_v27 = vld [vmem:[%s6675_s5 + $0x108] sm:$0xff]  }
  0x78   :  { %4556 = vmatpush3.bf16.msra.mxu1 %v5060_v28  ;;  %v5106_v28 = vld [vmem:[%s6675_s5 + $0x4f8] sm:$0xff]  }
  0x79   :  { %4557 = vmatprep.subr.bf16.mxu1 %v5062_v30  ;;  %v5108_v30 = vld [vmem:[%s6675_s5 + $0x4b8] sm:$0xff]  }
  0x7c   :  { %4558 = vmatpush3.bf16.msra.mxu1 %v5064_v31  ;;  %v5701_v31 = vld [vmem:[%s6676_s2 + $0x28] sm:$0xff] }
  0x7d   :  { %4559 = vmatprep.subr.bf16.mxu1 %v5066_v33  ;;  %v4993_v33 = vld [vmem:[%s6675_s5 + $0x110] sm:$0xff]  }
  0x80   :  { %4560 = vmatpush3.bf16.msra.mxu1 %v5068_v34  ;;  %v347_v34 = vunpack.c.h.s8.bf16 %v267_v18  ;;  %v5027_v18 = vld [vmem:[%s6675_s5 + $0x258] sm:$0xff]  }
  0x81   :  { %v32_v35 = vpop.permute.xlu0 %31  ;;  %v38_v41 = vpop.permute.xlu1 %37  ;;  %4561 = vmatprep.subr.bf16.mxu1 %v5070_v36  ;;  %v5110_v36 = vld [vmem:[%s6675_s5 + $0x5c0] sm:$0xff]  }
  0x82   :  { %vm42_vm7 = vcmp.eq.s32.totalorder %v32_v35, %v29_v32  ;;  %vm44_vm8 = vcmp.eq.s32.totalorder %v38_v41, %v29_v32  ;;  %v5112_v41 = vld [vmem:[%s6675_s5 + $0x580] sm:$0xff]  }
  0x83   :  { %v4010_v38 = vsel %vm42_vm7, 1.0, %v5290_v37  ;;  %v4012_v45 = vsel %vm44_vm8, 1.0, %v5290_v37 }
  0x84   :  { %4917 = vmatprep.mubr.msk.f32.mxu0 %vm56_vm6, %v4010_v38  ;;  %4562 = vmatpush3.bf16.msra.mxu1 %v5072_v42  ;;  %v285_v38 = vld [vmem:[%s6676_s2 + $0x90] sm:$0xff] }
  0x85   :  { %v35_v43 = vpop.permute.xlu0 %34  ;;  %4563 = vmatprep.subr.bf16.mxu1 %v5074_v46  ;;  %v5116_v46 = vld [vmem:[%s6675_s5 + $0x588] sm:$0xff]  }
  0x86   :  { %vm43_vm9 = vcmp.eq.s32.totalorder %v35_v43, %v29_v32  ;;  %v41_v48 = vpop.permute.xlu1 %40  ;;  %v4997_v43 = vld [vmem:[%s6675_s5 + $0x118] sm:$0xff]  }
  0x87   :  { %v4011_v47 = vsel %vm43_vm9, 1.0, %v5290_v37  ;;  %vm45_vm10 = vcmp.eq.s32.totalorder %v41_v48, %v29_v32  ;;  %v286_v32 = vld [vmem:[%s6676_s2 + $0x98] sm:$0xff]  ;;  %v365_v48 = vunpack.c.h.s8.bf16 %v285_v38 }
  0x88   :  { %4918 = vmatmul.mubr.msk.f32.vlgmr.msra.gmra.mrb[0].mxu0 %vm56_vm6, %v4011_v47  ;;  %v4013_v53 = vsel %vm45_vm10, 1.0, %v5290_v37  ;;  %4564 = vmatpush3.bf16.msra.mxu1 %v5076_v49  ;;  %v326_v35 = vunpack.c.l.s8.bf16 %v286_v32  ;;  %v312_v37 = vunpack.c.l.s8.bf16 %v5701_v31  ;;  %v366_v42 = vunpack.c.h.s8.bf16 %v286_v32  ;;  %v5001_v47 = vld [vmem:[%s6675_s5 + $0x120] sm:$0xff]   ;;  %v5118_v49 = vld [vmem:[%s6675_s5 + $0x5d0] sm:$0xff]  }
  0x89   :  { %4354 = vmatpush3.bf16.msra.mxu0 %v4953_v39  ;;  %4920 = vmatprep.mubr.msk.f32.mxu0 %vm56_vm6, %v4012_v45  ;;  %v4995_v39 = vld [vmem:[%s6675_s5 + $0x158] sm:$0xff]   ;;  %v4999_v45 = vld [vmem:[%s6675_s5 + $0x160] sm:$0xff]   ;;  %v5152_v32 = vld [vmem:[%s6675_s5 + $0x690] sm:$0xff]  }
  0x8a   :  { %4355 = vmatprep.subr.bf16.mxu0 %v4955_v40  ;;  %4605 = vmatprep.subr.bf16.mxu1 %v5078_v56  ;;  %v325_v40 = vunpack.c.l.s8.bf16 %v285_v38  ;;  %v5009_v56 = vld [vmem:[%s6675_s5 + $0x130] sm:$0xff]   ;;  %v5158_v38 = vld [vmem:[%s6675_s5 + $0x6e0] sm:$0xff]  }
  0x8b   :  { %3323 = vmatmul.mubr.bf16.vlgmr.msra.gmra.mrb[28].mxu1 %v321_v59  ;;  %v5013_v59 = vld [vmem:[%s6675_s5 + $0x138] sm:$0xff]  }
  0x8c   :  { %4921 = vmatmul.mubr.msk.f32.gmra.mrb[2].mxu0 %vm56_vm6, %v4013_v53  ;;  %4606 = vmatpush3.bf16.msra.mxu1 %v5080_v60  ;;  %v5122_v53 = vld [vmem:[%s6675_s5 + $0x5d8] sm:$0xff]   ;;  %v5128_v60 = vld [vmem:[%s6675_s5 + $0x5a0] sm:$0xff]  }
  0x8d   :  { %4356 = vmatpush3.bf16.msra.mxu0 %v4957_v50  ;;  %2979 = vmatprep.mubr.bf16.mxu0 %v308_v52  ;;  %v5003_v50 = vld [vmem:[%s6675_s5 + $0x168] sm:$0xff]  }
  0x8e   :  { %4357 = vmatprep.subr.bf16.mxu0 %v4959_v51  ;;  %4607 = vmatprep.subr.bf16.mxu1 %v5082_v62  ;;  %v5120_v51 = vld [vmem:[%s6675_s5 + $0x590] sm:$0xff]   ;;  %v5005_v52 = vld [vmem:[%s6675_s5 + $0x128] sm:$0xff]  }
  0x8f   :  { %3330 = vmatprep.mubr.bf16.mxu1 %v362_v63  ;;  %v5130_v62 = vld [vmem:[%s6675_s5 + $0x5e8] sm:$0xff]   ;;  %v5015_v63 = vld [vmem:[%s6675_s5 + $0x240] sm:$0xff]  }
  0x90   :  { %4608 = vmatpush3.bf16.msra.mxu1 %v5084_v1 }
  0x91   :  { %4358 = vmatpush3.bf16.msra.mxu0 %v4961_v58  ;;  %4609 = vmatprep.subr.bf16.mxu1 %v5086_v3  ;;  %v5011_v58 = vld [vmem:[%s6675_s5 + $0x178] sm:$0xff]   ;;  %v352_v3 = vunpack.c.h.s8.bf16 %v5701_v31  ;;  %v5037_v31 = vld [vmem:[%s6675_s5 + $0x228] sm:$0xff]  }
  0x92   :  { %4359 = vmatprep.subr.bf16.mxu0 %v4963_v61  ;;  %v271_v61 = vld [vmem:[%s6676_s2 + $0x20] sm:$0xff] }
  0x93   :  { %3331 = vmatmul.mubr.bf16.gmra.mrb[32].mxu1 %v361_v4  ;;  %v311_v1 = vunpack.c.l.s8.bf16 %v271_v61  ;;  %v5134_v4 = vld [vmem:[%s6675_s5 + $0x5f0] sm:$0xff]  }
  0x94   :  { %4610 = vmatpush3.bf16.msra.mxu1 %v5088_v6  ;;  %3420 = vmatprep.mubr.bf16.mxu1 %v326_v35  ;;  %v5021_v6 = vld [vmem:[%s6675_s5 + $0x208] sm:$0xff]   ;;  %v5041_v35 = vld [vmem:[%s6675_s5 + $0x230] sm:$0xff]  }
  0x95   :  { %4360 = vmatpush3.bf16.msra.mxu0 %v4965_v0  ;;  %4611 = vmatprep.subr.bf16.mxu1 %v5090_v8  ;;  %v5132_v0 = vld [vmem:[%s6675_s5 + $0x5a8] sm:$0xff]   ;;  %v5023_v8 = vld [vmem:[%s6675_s5 + $0x250] sm:$0xff]  }
  0x96   :  { %4361 = vmatprep.subr.bf16.mxu0 %v4967_v2  ;;  %v5017_v2 = vld [vmem:[%s6675_s5 + $0x200] sm:$0xff]  }
  0x98   :  { %4612 = vmatpush3.bf16.msra.mxu1 %v5092_v10  ;;  %v5810_v10 = vld [vmem:[%s6676_s2 + $0x48] sm:$0xff] }
  0x99   :  { %4362 = vmatpush3.bf16.msra.mxu0 %v4969_v5  ;;  %4613 = vmatprep.subr.bf16.mxu1 %v5094_v12  ;;  %v5019_v5 = vld [vmem:[%s6675_s5 + $0x248] sm:$0xff]   ;;  %v351_v12 = vunpack.c.h.s8.bf16 %v271_v61 }
  0x9a   :  { %4363 = vmatprep.subr.bf16.mxu0 %v4971_v7  ;;  %v5136_v7 = vld [vmem:[%s6675_s5 + $0x5b0] sm:$0xff]  }
  0x9c   :  { %4614 = vmatpush3.bf16.msra.mxu1 %v5096_v14  ;;  %v290_v14 = vld [vmem:[%s6676_s2 + $0xb8] sm:$0xff] }
  0x9d   :  { %4364 = vmatpush3.bf16.msra.mxu0 %v4973_v9  ;;  %4615 = vmatprep.subr.bf16.mxu1 %v5098_v17  ;;  %v5138_v9 = vld [vmem:[%s6675_s5 + $0x5f8] sm:$0xff]   ;;  %v5142_v17 = vld [vmem:[%s6675_s5 + $0x6c0] sm:$0xff]  }
  0x9e   :  { %4365 = vmatprep.subr.bf16.mxu0 %v4975_v11  ;;  %v5140_v11 = vld [vmem:[%s6675_s5 + $0x5b8] sm:$0xff]  }
  0xa0   :  { %4616 = vmatpush3.bf16.msra.mxu1 %v5100_v19  ;;  %v289_v19 = vld [vmem:[%s6676_s2 + $0xb0] sm:$0xff] }
  0xa1   :  { %4366 = vmatpush3.bf16.msra.mxu0 %v4977_v13  ;;  %4617 = vmatprep.subr.bf16.mxu1 %v5102_v21  ;;  %v5025_v13 = vld [vmem:[%s6675_s5 + $0x210] sm:$0xff]   ;;  %v329_v21 = vunpack.c.l.s8.bf16 %v289_v19 }
  0xa2   :  { %4367 = vmatprep.subr.bf16.mxu0 %v4979_v15  ;;  %v316_v15 = vunpack.c.l.s8.bf16 %v5810_v10 }
  0xa4   :  { %4618 = vmatpush3.bf16.msra.mxu1 %v5104_v25  ;;  %v5146_v25 = vld [vmem:[%s6675_s5 + $0x6c8] sm:$0xff]  }
  0xa5   :  { %4368 = vmatpush3.bf16.msra.mxu0 %v4981_v16  ;;  %4619 = vmatprep.subr.bf16.mxu1 %v5106_v28  ;;  %v330_v16 = vunpack.c.l.s8.bf16 %v290_v14  ;;  %v5035_v28 = vld [vmem:[%s6675_s5 + $0x268] sm:$0xff]  }
  0xa6   :  { %4409 = vmatprep.subr.bf16.mxu0 %v4983_v20  ;;  %v5029_v20 = vld [vmem:[%s6675_s5 + $0x218] sm:$0xff]  }
  0xa8   :  { %2980 = vmatmul.mubr.bf16.vlgmr.msra.gmra.mrb[4].mxu0 %v307_v22  ;;  %4620 = vmatpush3.bf16.msra.mxu1 %v5108_v30  ;;  %v370_v22 = vunpack.c.h.s8.bf16 %v290_v14  ;;  %v369_v30 = vunpack.c.h.s8.bf16 %v289_v19  ;;  %v5065_v14 = vld [vmem:[%s6675_s5 + $0x320] sm:$0xff]   ;;  %v5069_v19 = vld [vmem:[%s6675_s5 + $0x328] sm:$0xff]  }
  0xa9   :  { %4410 = vmatpush3.bf16.msra.mxu0 %v4985_v23  ;;  %2987 = vmatprep.mubr.bf16.mxu0 %v348_v24  ;;  %v5144_v23 = vld [vmem:[%s6675_s5 + $0x680] sm:$0xff]  }
  0xaa   :  { %4411 = vmatprep.subr.bf16.mxu0 %v4987_v26  ;;  %4661 = vmatprep.subr.bf16.mxu1 %v5110_v36  ;;  %v5031_v24 = vld [vmem:[%s6675_s5 + $0x260] sm:$0xff]   ;;  %v5156_v36 = vld [vmem:[%s6675_s5 + $0x698] sm:$0xff]  }
  0xab   :  { %3421 = vmatmul.mubr.bf16.vlgmr.msra.gmra.mrb[36].mxu1 %v325_v40  ;;  %v5033_v26 = vld [vmem:[%s6675_s5 + $0x220] sm:$0xff]   ;;  %v5045_v40 = vld [vmem:[%s6675_s5 + $0x238] sm:$0xff]  }
  0xac   :  { %4662 = vmatpush3.bf16.msra.mxu1 %v5112_v41  ;;  %3428 = vmatprep.mubr.bf16.mxu1 %v366_v42  ;;  %v275_v41 = vld [vmem:[%s6676_s2 + $0x40] sm:$0xff] }
  0xad   :  { %4412 = vmatpush3.bf16.msra.mxu0 %v4989_v27  ;;  %4663 = vmatprep.subr.bf16.mxu1 %v5114_v44  ;;  %v5148_v27 = vld [vmem:[%s6675_s5 + $0x688] sm:$0xff]  }
  0xae   :  { %4413 = vmatprep.subr.bf16.mxu0 %v4991_v29  ;;  %v5150_v29 = vld [vmem:[%s6675_s5 + $0x6d0] sm:$0xff]  }
  0xb0   :  { %2988 = vmatmul.mubr.bf16.gmra.mrb[8].mxu0 %v347_v34  ;;  %4664 = vmatpush3.bf16.msra.mxu1 %v5116_v46  ;;  %v5154_v34 = vld [vmem:[%s6675_s5 + $0x6d8] sm:$0xff]  }
  0xb1   :  { %4414 = vmatpush3.bf16.msra.mxu0 %v4993_v33  ;;  %3077 = vmatprep.mubr.bf16.mxu0 %v312_v37  ;;  %v5039_v33 = vld [vmem:[%s6675_s5 + $0x270] sm:$0xff]   ;;  %v5043_v37 = vld [vmem:[%s6675_s5 + $0x278] sm:$0xff]  }
  0xb2   :  { %4415 = vmatprep.subr.bf16.mxu0 %v4995_v39  ;;  %4665 = vmatprep.subr.bf16.mxu1 %v5118_v49  ;;  %v315_v49 = vunpack.c.l.s8.bf16 %v275_v41 }
  0xb3   :  { %3429 = vmatmul.mubr.bf16.gmra.mrb[40].mxu1 %v365_v48  ;;  %v5049_v48 = vld [vmem:[%s6675_s5 + $0x300] sm:$0xff]  }
  0xb4   :  { %4666 = vmatpush3.bf16.msra.mxu1 %v5120_v51  ;;  %3518 = vmatprep.mubr.bf16.mxu1 %v330_v16  ;;  %v5052_v51 = vld [vmem:[%s6675_s5 + $0x348] sm:$0xff]  }
  0xb5   :  { %4416 = vmatpush3.bf16.msra.mxu0 %v4997_v43  ;;  %4667 = vmatprep.subr.bf16.mxu1 %v5122_v53  ;;  %v5160_v43 = vld [vmem:[%s6675_s5 + $0x6a0] sm:$0xff]   ;;  %v5166_v53 = vld [vmem:[%s6675_s5 + $0x6f0] sm:$0xff]   ;;  %v5067_v16 = vld [vmem:[%s6675_s5 + $0x368] sm:$0xff]  }
  0xb6   :  { %4417 = vmatprep.subr.bf16.mxu0 %v4999_v45  ;;  %v5047_v45 = vld [vmem:[%s6675_s5 + $0x340] sm:$0xff]  }
  0xb8   :  { %4668 = vmatpush3.bf16.msra.mxu1 %v5124_v55  ;;  %v5056_v55 = vld [vmem:[%s6675_s5 + $0x350] sm:$0xff]  }
  0xb9   :  { %4418 = vmatpush3.bf16.msra.mxu0 %v5001_v47  ;;  %4669 = vmatprep.subr.bf16.mxu1 %v5126_v57  ;;  %v5162_v47 = vld [vmem:[%s6675_s5 + $0x6e8] sm:$0xff]  }
  0xba   :  { %4419 = vmatprep.subr.bf16.mxu0 %v5003_v50  ;;  %v5164_v50 = vld [vmem:[%s6675_s5 + $0x6a8] sm:$0xff]  }
  0xbb   :  { %v5931_v57 = vld [vmem:[%s6676_s2 + $0x68] sm:$0xff] }
  0xbc   :  { %4670 = vmatpush3.bf16.msra.mxu1 %v5128_v60 }
  0xbd   :  { %4420 = vmatpush3.bf16.msra.mxu0 %v5005_v52  ;;  %4671 = vmatprep.subr.bf16.mxu1 %v5130_v62  ;;  %v356_v52 = vunpack.c.h.s8.bf16 %v5810_v10  ;;  %v355_v62 = vunpack.c.h.s8.bf16 %v275_v41  ;;  %v360_v41 = vunpack.c.h.s8.bf16 %v5931_v57 }
  0xbe   :  { %4421 = vmatprep.subr.bf16.mxu0 %v5007_v54  ;;  %v5053_v54 = vld [vmem:[%s6675_s5 + $0x308] sm:$0xff]  }
  0xc0   :  { %4672 = vmatpush3.bf16.msra.mxu1 %v5132_v0 }
  0xc1   :  { %4422 = vmatpush3.bf16.msra.mxu0 %v5009_v56  ;;  %4673 = vmatprep.subr.bf16.mxu1 %v5134_v4  ;;  %v5168_v56 = vld [vmem:[%s6675_s5 + $0x6b0] sm:$0xff]   ;;  %v294_v4 = vld [vmem:[%s6676_s2 + $0xd8] sm:$0xff] }
  0xc2   :  { %4423 = vmatprep.subr.bf16.mxu0 %v5011_v58  ;;  %v374_v10 = vunpack.c.h.s8.bf16 %v294_v4 }
  0xc4   :  { %4674 = vmatpush3.bf16.msra.mxu1 %v5136_v7  ;;  %v293_v7 = vld [vmem:[%s6676_s2 + $0xd0] sm:$0xff] }
  0xc5   :  { %4424 = vmatpush3.bf16.msra.mxu0 %v5013_v59  ;;  %4675 = vmatprep.subr.bf16.mxu1 %v5138_v9  ;;  %v5170_v59 = vld [vmem:[%s6675_s5 + $0x6f8] sm:$0xff]   ;;  %v333_v9 = vunpack.c.l.s8.bf16 %v293_v7 }
  0xc6   :  { %4465 = vmatprep.subr.bf16.mxu0 %v5015_v63  ;;  %v5172_v63 = vld [vmem:[%s6675_s5 + $0x6b8] sm:$0xff]  }
  0xc8   :  { %3078 = vmatmul.mubr.bf16.vlgmr.msra.gmra.mrb[12].mxu0 %v311_v1  ;;  %4676 = vmatpush3.bf16.msra.mxu1 %v5140_v11  ;;  %v5057_v1 = vld [vmem:[%s6675_s5 + $0x310] sm:$0xff]   ;;  %v5176_v11 = vld [vmem:[%s6675_s5 + $0x780] sm:$0xff]  }
  0xc9   :  { %4466 = vmatpush3.bf16.msra.mxu0 %v5017_v2  ;;  %3085 = vmatprep.mubr.bf16.mxu0 %v352_v3  ;;  %v5059_v2 = vld [vmem:[%s6675_s5 + $0x358] sm:$0xff]   ;;  %v320_v3 = vunpack.c.l.s8.bf16 %v5931_v57 }
  0xca   :  { %4467 = vmatprep.subr.bf16.mxu0 %v5019_v5  ;;  %4717 = vmatprep.subr.bf16.mxu1 %v5142_v17  ;;  %v334_v5 = vunpack.c.l.s8.bf16 %v294_v4  ;;  %v5182_v17 = vld [vmem:[%s6675_s5 + $0x7d0] sm:$0xff]   ;;  %v5091_v57 = vld [vmem:[%s6675_s5 + $0x458] sm:$0xff]   ;;  %v5208_v4 = vld [vmem:[%s6675_s5 + $0x880] sm:$0xff]  }
  0xcb   :  { %3519 = vmatmul.mubr.bf16.vlgmr.msra.gmra.mrb[44].mxu1 %v329_v21  ;;  %v5071_v21 = vld [vmem:[%s6675_s5 + $0x370] sm:$0xff]  }
  0xcc   :  { %4718 = vmatpush3.bf16.msra.mxu1 %v5144_v23  ;;  %3526 = vmatprep.mubr.bf16.mxu1 %v370_v22  ;;  %v5186_v22 = vld [vmem:[%s6675_s5 + $0x7d8] sm:$0xff]   ;;  %v5073_v23 = vld [vmem:[%s6675_s5 + $0x330] sm:$0xff]  }
  0xcd   :  { %4468 = vmatpush3.bf16.msra.mxu0 %v5021_v6  ;;  %4719 = vmatprep.subr.bf16.mxu1 %v5146_v25  ;;  %v5174_v6 = vld [vmem:[%s6675_s5 + $0x7c0] sm:$0xff]   ;;  %v5075_v25 = vld [vmem:[%s6675_s5 + $0x378] sm:$0xff]  }
  0xce   :  { %4469 = vmatprep.subr.bf16.mxu0 %v5023_v8  ;;  %v5061_v8 = vld [vmem:[%s6675_s5 + $0x318] sm:$0xff]  }
  0xd0   :  { %3086 = vmatmul.mubr.bf16.gmra.mrb[16].mxu0 %v351_v12  ;;  %4720 = vmatpush3.bf16.msra.mxu1 %v5148_v27  ;;  %v5063_v12 = vld [vmem:[%s6675_s5 + $0x360] sm:$0xff]  }
  0xd1   :  { %4470 = vmatpush3.bf16.msra.mxu0 %v5025_v13  ;;  %3175 = vmatprep.mubr.bf16.mxu0 %v316_v15  ;;  %v5178_v13 = vld [vmem:[%s6675_s5 + $0x7c8] sm:$0xff]   ;;  %v5190_v27 = vld [vmem:[%s6675_s5 + $0x7e0] sm:$0xff]  }
  0xd2   :  { %4471 = vmatprep.subr.bf16.mxu0 %v5027_v18  ;;  %4721 = vmatprep.subr.bf16.mxu1 %v5150_v29  ;;  %v5180_v15 = vld [vmem:[%s6675_s5 + $0x788] sm:$0xff]   ;;  %v373_v18 = vunpack.c.h.s8.bf16 %v293_v7  ;;  %v279_v29 = vld [vmem:[%s6676_s2 + $0x60] sm:$0xff] }
  0xd3   :  { %3527 = vmatmul.mubr.bf16.gmra.mrb[48].mxu1 %v369_v30  ;;  %v5097_v7 = vld [vmem:[%s6675_s5 + $0x420] sm:$0xff]  }
  0xd4   :  { %4722 = vmatpush3.bf16.msra.mxu1 %v5152_v32  ;;  %3616 = vmatprep.mubr.bf16.mxu1 %v334_v5 }
  0xd5   :  { %4472 = vmatpush3.bf16.msra.mxu0 %v5029_v20  ;;  %4723 = vmatprep.subr.bf16.mxu1 %v5154_v34  ;;  %v5184_v20 = vld [vmem:[%s6675_s5 + $0x790] sm:$0xff]   ;;  %v5079_v34 = vld [vmem:[%s6675_s5 + $0x440] sm:$0xff]  }
  0xd6   :  { %4473 = vmatprep.subr.bf16.mxu0 %v5031_v24  ;;  %v5188_v24 = vld [vmem:[%s6675_s5 + $0x798] sm:$0xff]  }
  0xd8   :  { %4724 = vmatpush3.bf16.msra.mxu1 %v5156_v36  ;;  %v5194_v36 = vld [vmem:[%s6675_s5 + $0x7e8] sm:$0xff]  }
  0xd9   :  { %4474 = vmatpush3.bf16.msra.mxu0 %v5033_v26  ;;  %4725 = vmatprep.subr.bf16.mxu1 %v5158_v38  ;;  %v5077_v26 = vld [vmem:[%s6675_s5 + $0x338] sm:$0xff]   ;;  %v319_v38 = vunpack.c.l.s8.bf16 %v279_v29 }
  0xda   :  { %4475 = vmatprep.subr.bf16.mxu0 %v5035_v28 }
  0xdc   :  { %4726 = vmatpush3.bf16.msra.mxu1 %v5160_v43  ;;  %v5196_v43 = vld [vmem:[%s6675_s5 + $0x7a8] sm:$0xff]  }
  0xdd   :  { %4476 = vmatpush3.bf16.msra.mxu0 %v5037_v31  ;;  %4727 = vmatprep.subr.bf16.mxu1 %v5162_v47  ;;  %v5192_v31 = vld [vmem:[%s6675_s5 + $0x7a0] sm:$0xff]   ;;  %v5085_v47 = vld [vmem:[%s6675_s5 + $0x408] sm:$0xff]  }
  0xde   :  { %4477 = vmatprep.subr.bf16.mxu0 %v5039_v33  ;;  %v5879_v39 = vpop.f32.mrb[0].mxu1 }
  0xdf   :  { %5270 = vrcp.f32 %v5879_v39  ;;  %v5888_v42 = vpop.f32.mrb[1].mxu1 }
  0xe0   :  { %5272 = vrcp.f32 %v5888_v42  ;;  %v5894_v44 = vpop.f32.mrb[2].mxu1  ;;  %4728 = vmatpush3.bf16.msra.mxu1 %v5164_v50  ;;  %v5200_v50 = vld [vmem:[%s6675_s5 + $0x7b0] sm:$0xff]  }
  0xe1   :  { %4478 = vmatpush3.bf16.msra.mxu0 %v5041_v35  ;;  %5274 = vrcp.f32 %v5894_v44  ;;  %v5900_v46 = vpop.f32.mrb[3].mxu1  ;;  %4729 = vmatprep.subr.bf16.mxu1 %v5166_v53  ;;  %v359_v53 = vunpack.c.h.s8.bf16 %v279_v29  ;;  %v5111_v29 = vld [vmem:[%s6675_s5 + $0x540] sm:$0xff]  }
  0xe2   :  { %4479 = vmatprep.subr.bf16.mxu0 %v5043_v37  ;;  %5276 = vrcp.f32 %v5900_v46 }
  0xe4   :  { %4730 = vmatpush3.bf16.msra.mxu1 %v5168_v56  ;;  %v5204_v56 = vld [vmem:[%s6675_s5 + $0x7b8] sm:$0xff]  }
  0xe5   :  { %4480 = vmatpush3.bf16.msra.mxu0 %v5045_v40  ;;  %4731 = vmatprep.subr.bf16.mxu1 %v5170_v59  ;;  %v5081_v40 = vld [vmem:[%s6675_s5 + $0x400] sm:$0xff]   ;;  %v5093_v59 = vld [vmem:[%s6675_s5 + $0x418] sm:$0xff]  }
  0xe6   :  { %4521 = vmatprep.subr.bf16.mxu0 %v5047_v45  ;;  %v5083_v45 = vld [vmem:[%s6675_s5 + $0x448] sm:$0xff]  }
  0xe8   :  { %3176 = vmatmul.mubr.bf16.vlgmr.msra.gmra.mrb[20].mxu0 %v315_v49  ;;  %4732 = vmatpush3.bf16.msra.mxu1 %v5172_v63  ;;  %v5087_v49 = vld [vmem:[%s6675_s5 + $0x450] sm:$0xff]  }
  0xe9   :  { %4522 = vmatpush3.bf16.msra.mxu0 %v5049_v48  ;;  %3183 = vmatprep.mubr.bf16.mxu0 %v356_v52  ;;  %v5271_v58 = vpop.eup %5270  ;;  %v5198_v48 = vld [vmem:[%s6675_s5 + $0x7f0] sm:$0xff]   ;;  %v5202_v52 = vld [vmem:[%s6675_s5 + $0x7f8] sm:$0xff]  }
  0xea   :  { %4523 = vmatprep.subr.bf16.mxu0 %v5052_v51  ;;  %v5273_v60 = vpop.eup %5272  ;;  %255 = vperm.xlu1 %4946, %v5271_v58   ;;  %v6047_v51 = vld [vmem:[%s6676_s2 + $0x88] sm:$0xff]  ;;  %v298_v58 = vld [vmem:[%s6676_s2 + $0xf8] sm:$0xff] }
  0xeb   :  { %v5275_v61 = vpop.eup %5274  ;;  %245 = vperm.xlu0 %4947, %v5273_v60   ;;  %4773 = vmatprep.subr.bf16.mxu1 %v5174_v6  ;;  %v338_v60 = vunpack.c.l.s8.bf16 %v298_v58 }
  0xec   :  { %v5277_v0 = vpop.eup %5276  ;;  %3617 = vmatmul.mubr.bf16.vlgmr.msra.gmra.mrb[52].mxu1 %v333_v9  ;;  %v5210_v9 = vld [vmem:[%s6675_s5 + $0x8c8] sm:$0xff]  }
  0xed   :  { %4524 = vmatpush3.bf16.msra.mxu0 %v5053_v54  ;;  %4774 = vmatpush3.bf16.msra.mxu1 %v5176_v11  ;;  %v5089_v54 = vld [vmem:[%s6675_s5 + $0x410] sm:$0xff]   ;;  %v5099_v11 = vld [vmem:[%s6675_s5 + $0x468] sm:$0xff]  }
  0xee   :  { %4525 = vmatprep.subr.bf16.mxu0 %v5056_v55  ;;  %250 = vperm.xlu1 %4946, %v5277_v0   ;;  %v324_v55 = vunpack.c.l.s8.bf16 %v6047_v51  ;;  %v5095_v0 = vld [vmem:[%s6675_s5 + $0x460] sm:$0xff]  }
  0xef   :  { %260 = vperm.xlu0 %4947, %v5275_v61   ;;  %3624 = vmatprep.mubr.bf16.mxu1 %v374_v10  ;;  %v5206_v61 = vld [vmem:[%s6675_s5 + $0x8c0] sm:$0xff]  }
  0xf0   :  { %3184 = vmatmul.mubr.bf16.gmra.mrb[24].mxu0 %v355_v62  ;;  %4775 = vmatprep.subr.bf16.mxu1 %v5178_v13  ;;  %v297_v62 = vld [vmem:[%s6676_s2 + $0xf0] sm:$0xff]  ;;  %v5101_v13 = vld [vmem:[%s6675_s5 + $0x428] sm:$0xff]  }
  0xf1   :  { %4526 = vmatpush3.bf16.msra.mxu0 %v5057_v1  ;;  %3273 = vmatprep.mubr.bf16.mxu0 %v320_v3  ;;  %v337_v1 = vunpack.c.l.s8.bf16 %v297_v62 }
  0xf2   :  { %4527 = vmatprep.subr.bf16.mxu0 %v5059_v2  ;;  %4776 = vmatpush3.bf16.msra.mxu1 %v5180_v15  ;;  %v378_v2 = vunpack.c.h.s8.bf16 %v298_v58  ;;  %v5214_v15 = vld [vmem:[%s6675_s5 + $0x8d0] sm:$0xff]  }
  0xf3   :  { %4777 = vmatprep.subr.bf16.mxu1 %v5182_v17  ;;  %v5216_v17 = vld [vmem:[%s6675_s5 + $0x890] sm:$0xff]  }
  0xf4   :  { %3625 = vmatmul.mubr.bf16.gmra.mrb[56].mxu1 %v373_v18  ;;  %v5105_v18 = vld [vmem:[%s6675_s5 + $0x430] sm:$0xff]  }
  0xf5   :  { %4528 = vmatpush3.bf16.msra.mxu0 %v5061_v8  ;;  %3714 = vmatprep.mubr.bf16.mxu1 %v338_v60  ;;  %v5123_v60 = vld [vmem:[%s6675_s5 + $0x558] sm:$0xff]  }
  0xf6   :  { %4529 = vmatprep.subr.bf16.mxu0 %v5063_v12  ;;  %4778 = vmatpush3.bf16.msra.mxu1 %v5184_v20  ;;  %v5212_v12 = vld [vmem:[%s6675_s5 + $0x888] sm:$0xff]   ;;  %v5107_v20 = vld [vmem:[%s6675_s5 + $0x478] sm:$0xff]  }
  0xf7   :  { %4779 = vmatprep.subr.bf16.mxu1 %v5186_v22  ;;  %v5220_v22 = vld [vmem:[%s6675_s5 + $0x898] sm:$0xff]  }
  0xf9   :  { %4530 = vmatpush3.bf16.msra.mxu0 %v5065_v14  ;;  %v377_v14 = vunpack.c.h.s8.bf16 %v297_v62  ;;  %v5125_v62 = vld [vmem:[%s6675_s5 + $0x518] sm:$0xff]  }
  0xfa   :  { %4531 = vmatprep.subr.bf16.mxu0 %v5067_v16  ;;  %4780 = vmatpush3.bf16.msra.mxu1 %v5188_v24  ;;  %v5103_v16 = vld [vmem:[%s6675_s5 + $0x470] sm:$0xff]   ;;  %v283_v24 = vld [vmem:[%s6676_s2 + $0x80] sm:$0xff] }
  0xfb   :  { %4781 = vmatprep.subr.bf16.mxu1 %v5190_v27 }
  0xfd   :  { %4532 = vmatpush3.bf16.msra.mxu0 %v5069_v19  ;;  %v5218_v19 = vld [vmem:[%s6675_s5 + $0x8d8] sm:$0xff]  }
  0xfe   :  { %4533 = vmatprep.subr.bf16.mxu0 %v5071_v21  ;;  %v4397_v28 = vpop.f32.mrb[4].mxu1  ;;  %4782 = vmatpush3.bf16.msra.mxu1 %v5192_v31  ;;  %v5109_v21 = vld [vmem:[%s6675_s5 + $0x438] sm:$0xff]   ;;  %v5224_v31 = vld [vmem:[%s6675_s5 + $0x8a0] sm:$0xff]  }
  0xff   :  { %v4398_v30 = vpop.f32.mrb[5].mxu1  ;;  %4783 = vmatprep.subr.bf16.mxu1 %v5194_v36  ;;  %v364_v36 = vunpack.c.h.s8.bf16 %v6047_v51 }
 0x100   :  { %v6012_v32 = vadd.f32 %v4398_v30, %v4397_v28  ;;  %v4400_v33 = vpop.f32.mrb[6].mxu1 }
 0x101   :  { %4534 = vmatpush3.bf16.msra.mxu0 %v5073_v23  ;;  %v4401_v35 = vpop.f32.mrb[7].mxu1 }
 0x102   :  { %4535 = vmatprep.subr.bf16.mxu0 %v5075_v25  ;;  %v6020_v37 = vadd.f32 %v4401_v35, %v4400_v33  ;;  %4784 = vmatpush3.bf16.msra.mxu1 %v5196_v43  ;;  %v5113_v35 = vld [vmem:[%s6675_s5 + $0x500] sm:$0xff]   ;;  %v5228_v43 = vld [vmem:[%s6675_s5 + $0x8a8] sm:$0xff]  }
 0x103   :  { %4785 = vmatprep.subr.bf16.mxu1 %v5198_v48 }
 0x105   :  { %4536 = vmatpush3.bf16.msra.mxu0 %v5077_v26  ;;  %v5222_v26 = vld [vmem:[%s6675_s5 + $0x8e0] sm:$0xff]  }
 0x106   :  { %4577 = vmatprep.subr.bf16.mxu0 %v5079_v34  ;;  %4786 = vmatpush3.bf16.msra.mxu1 %v5200_v50  ;;  %v4403_v63 = vpop.f32.mrb[8].mxu1  ;;  %v323_v34 = vunpack.c.l.s8.bf16 %v283_v24 }
 0x107   :  { %4787 = vmatprep.subr.bf16.mxu1 %v5202_v52  ;;  %v4404_v3 = vpop.f32.mrb[9].mxu1  ;;  %v6166_v52 = vld [vmem:[%s6676_s2 + $0xa8] sm:$0xff] }
 0x108   :  { %3274 = vmatmul.mubr.bf16.vlgmr.msra.gmra.mrb[28].mxu0 %v319_v38  ;;  %v6080_v5 = vadd.f32 %v4404_v3, %v4403_v63  ;;  %v4406_v6 = vpop.f32.mrb[10].mxu1  ;;  %v5226_v38 = vld [vmem:[%s6675_s5 + $0x8e8] sm:$0xff]   ;;  %v328_v58 = vunpack.c.l.s8.bf16 %v6166_v52  ;;  %v302_v63 = vld [vmem:[%s6676_s2 + $0x118] sm:$0xff]  ;;  %v301_v3 = vld [vmem:[%s6676_s2 + $0x110] sm:$0xff] }
 0x109   :  { %4578 = vmatpush3.bf16.msra.mxu0 %v5081_v40  ;;  %3281 = vmatprep.mubr.bf16.mxu0 %v360_v41  ;;  %v4407_v8 = vpop.f32.mrb[11].mxu1  ;;  %v5115_v40 = vld [vmem:[%s6675_s5 + $0x548] sm:$0xff]  }
 0x10a   :  { %4579 = vmatprep.subr.bf16.mxu0 %v5083_v45  ;;  %4788 = vmatpush3.bf16.msra.mxu1 %v5204_v56  ;;  %v6088_v10 = vadd.f32 %v4407_v8, %v4406_v6  ;;  %v5117_v41 = vld [vmem:[%s6675_s5 + $0x508] sm:$0xff]   ;;  %v363_v56 = vunpack.c.h.s8.bf16 %v283_v24  ;;  %v341_v6 = vunpack.c.l.s8.bf16 %v301_v3  ;;  %v5240_v8 = vld [vmem:[%s6675_s5 + $0x980] sm:$0xff]  }
 0x10b   :  { %4829 = vmatprep.subr.bf16.mxu1 %v5206_v61  ;;  %v5236_v61 = vld [vmem:[%s6675_s5 + $0x8b8] sm:$0xff]  }
 0x10d   :  { %4580 = vmatpush3.bf16.msra.mxu0 %v5085_v47  ;;  %3715 = vmatmul.mubr.bf16.vlgmr.msra.gmra.mrb[60].mxu1 %v337_v1  ;;  %v5119_v47 = vld [vmem:[%s6675_s5 + $0x550] sm:$0xff]   ;;  %v5238_v1 = vld [vmem:[%s6675_s5 + $0x9c0] sm:$0xff]  }
 0x10e   :  { %4581 = vmatprep.subr.bf16.mxu0 %v5087_v49  ;;  %4830 = vmatpush3.bf16.msra.mxu1 %v5208_v4  ;;  %v5230_v49 = vld [vmem:[%s6675_s5 + $0x8f0] sm:$0xff]   ;;  %v5129_v4 = vld [vmem:[%s6675_s5 + $0x520] sm:$0xff]  }
 0x10f   :  { %3722 = vmatprep.mubr.bf16.mxu1 %v378_v2  ;;  %4831 = vmatprep.subr.bf16.mxu1 %v5210_v9  ;;  %v5127_v2 = vld [vmem:[%s6675_s5 + $0x560] sm:$0xff]   ;;  %v5131_v9 = vld [vmem:[%s6675_s5 + $0x568] sm:$0xff]  }
 0x110   :  { %3282 = vmatmul.mubr.bf16.gmra.mrb[32].mxu0 %v359_v53 }
 0x111   :  { %4582 = vmatpush3.bf16.msra.mxu0 %v5089_v54  ;;  %3371 = vmatprep.mubr.bf16.mxu0 %v324_v55  ;;  %v5232_v54 = vld [vmem:[%s6675_s5 + $0x8b0] sm:$0xff]  }
 0x112   :  { %4583 = vmatprep.subr.bf16.mxu0 %v5091_v57  ;;  %4832 = vmatpush3.bf16.msra.mxu1 %v5212_v12  ;;  %v5121_v57 = vld [vmem:[%s6675_s5 + $0x510] sm:$0xff]   ;;  %v5133_v12 = vld [vmem:[%s6675_s5 + $0x528] sm:$0xff]  }
 0x113   :  { %4833 = vmatprep.subr.bf16.mxu1 %v5214_v15  ;;  %v381_v15 = vunpack.c.h.s8.bf16 %v301_v3  ;;  %v306_v3 = vld [vmem:[%s6676_s2 + $0x138] sm:$0xff] }
 0x115   :  { %4584 = vmatpush3.bf16.msra.mxu0 %v5093_v59  ;;  %3723 = vmatmul.mubr.bf16.gmra.mrb[64].mxu1 %v377_v14  ;;  %v5234_v59 = vld [vmem:[%s6675_s5 + $0x8f8] sm:$0xff]   ;;  %v5135_v14 = vld [vmem:[%s6675_s5 + $0x570] sm:$0xff]  }
 0x116   :  { %4585 = vmatprep.subr.bf16.mxu0 %v5095_v0  ;;  %4834 = vmatpush3.bf16.msra.mxu1 %v5216_v17  ;;  %v342_v0 = vunpack.c.l.s8.bf16 %v302_v63  ;;  %v5137_v17 = vld [vmem:[%s6675_s5 + $0x530] sm:$0xff]  }
 0x117   :  { %4835 = vmatprep.subr.bf16.mxu1 %v5218_v19  ;;  %v5139_v19 = vld [vmem:[%s6675_s5 + $0x578] sm:$0xff]  }
 0x118   :  { %3812 = vmatprep.mubr.bf16.mxu1 %v342_v0  ;;  %v5266_v0 = vld [vmem:[%s6675_s5 + $0x9f8] sm:$0xff]  }
 0x119   :  { %4586 = vmatpush3.bf16.msra.mxu0 %v5097_v7  ;;  %v382_v7 = vunpack.c.h.s8.bf16 %v302_v63 }
 0x11a   :  { %4587 = vmatprep.subr.bf16.mxu0 %v5099_v11  ;;  %4836 = vmatpush3.bf16.msra.mxu1 %v5220_v22  ;;  %v5242_v11 = vld [vmem:[%s6675_s5 + $0x9c8] sm:$0xff]   ;;  %v287_v22 = vld [vmem:[%s6676_s2 + $0xa0] sm:$0xff] }
 0x11b   :  { %4837 = vmatprep.subr.bf16.mxu1 %v5222_v26 }
 0x11d   :  { %4588 = vmatpush3.bf16.msra.mxu0 %v5101_v13  ;;  %v5244_v13 = vld [vmem:[%s6675_s5 + $0x988] sm:$0xff]  }
 0x11e   :  { %4589 = vmatprep.subr.bf16.mxu0 %v5103_v16  ;;  %v4453_v23 = vpop.f32.mrb[12].mxu1  ;;  %4838 = vmatpush3.bf16.msra.mxu1 %v5224_v31  ;;  %v5246_v16 = vld [vmem:[%s6675_s5 + $0x9d0] sm:$0xff]   ;;  %v5145_v31 = vld [vmem:[%s6675_s5 + $0x600] sm:$0xff]  }
 0x11f   :  { %v4454_v25 = vpop.f32.mrb[13].mxu1  ;;  %4839 = vmatprep.subr.bf16.mxu1 %v5226_v38 }
 0x120   :  { %v6129_v27 = vadd.f32 %v4454_v25, %v4453_v23  ;;  %v4456_v28 = vpop.f32.mrb[14].mxu1  ;;  %v5252_v23 = vld [vmem:[%s6675_s5 + $0x998] sm:$0xff]   ;;  %v5143_v25 = vld [vmem:[%s6675_s5 + $0x640] sm:$0xff]  }
 0x121   :  { %4590 = vmatpush3.bf16.msra.mxu0 %v5105_v18  ;;  %v4457_v30 = vpop.f32.mrb[15].mxu1  ;;  %v5248_v18 = vld [vmem:[%s6675_s5 + $0x990] sm:$0xff]  }
 0x122   :  { %4591 = vmatprep.subr.bf16.mxu0 %v5107_v20  ;;  %v6137_v33 = vadd.f32 %v4457_v30, %v4456_v28  ;;  %4840 = vmatpush3.bf16.msra.mxu1 %v5228_v43  ;;  %v5250_v20 = vld [vmem:[%s6675_s5 + $0x9d8] sm:$0xff]   ;;  %v5254_v28 = vld [vmem:[%s6675_s5 + $0x9e0] sm:$0xff]   ;;  %v5258_v43 = vld [vmem:[%s6675_s5 + $0x9e8] sm:$0xff]  }
 0x123   :  { %4841 = vmatprep.subr.bf16.mxu1 %v5230_v49 }
 0x125   :  { %4592 = vmatpush3.bf16.msra.mxu0 %v5109_v21  ;;  %v5141_v21 = vld [vmem:[%s6675_s5 + $0x538] sm:$0xff]  }
 0x126   :  { %4633 = vmatprep.subr.bf16.mxu0 %v5111_v29  ;;  %v4459_v45 = vpop.f32.mrb[16].mxu1  ;;  %4842 = vmatpush3.bf16.msra.mxu1 %v5232_v54 }
 0x127   :  { %v4460_v48 = vpop.f32.mrb[17].mxu1  ;;  %4843 = vmatprep.subr.bf16.mxu1 %v5234_v59  ;;  %v367_v59 = vunpack.c.h.s8.bf16 %v287_v22 }
 0x128   :  { %3372 = vmatmul.mubr.bf16.vlgmr.msra.gmra.mrb[36].mxu0 %v323_v34  ;;  %v6161_v50 = vadd.f32 %v4460_v48, %v4459_v45  ;;  %v4462_v51 = vpop.f32.mrb[18].mxu1  ;;  %v5149_v45 = vld [vmem:[%s6675_s5 + $0x608] sm:$0xff]  }
 0x129   :  { %4634 = vmatpush3.bf16.msra.mxu0 %v5113_v35  ;;  %3379 = vmatprep.mubr.bf16.mxu0 %v364_v36  ;;  %v4463_v53 = vpop.f32.mrb[19].mxu1  ;;  %v327_v35 = vunpack.c.l.s8.bf16 %v287_v22  ;;  %v5256_v36 = vld [vmem:[%s6675_s5 + $0x9a0] sm:$0xff]   ;;  %v5260_v48 = vld [vmem:[%s6675_s5 + $0x9a8] sm:$0xff]   ;;  %v5173_v22 = vld [vmem:[%s6675_s5 + $0x638] sm:$0xff]  }
 0x12a   :  { %4635 = vmatprep.subr.bf16.mxu0 %v5115_v40  ;;  %v6171_v55 = vadd.f32 %v4463_v53, %v4462_v51  ;;  %4844 = vmatpush3.bf16.msra.mxu1 %v5236_v61  ;;  %v5147_v40 = vld [vmem:[%s6675_s5 + $0x648] sm:$0xff]   ;;  %v5262_v53 = vld [vmem:[%s6675_s5 + $0x9f0] sm:$0xff]  }
 0x12b   :  { %4885 = vmatprep.subr.bf16.mxu1 %v5238_v1  ;;  %v6281_v51 = vld [vmem:[%s6676_s2 + $0xc8] sm:$0xff]  ;;  %v5268_v1 = vld [vmem:[%s6675_s5 + $0x9b8] sm:$0xff]  }
 0x12c   :  { %v332_v63 = vunpack.c.l.s8.bf16 %v6281_v51 }
 0x12d   :  { %4636 = vmatpush3.bf16.msra.mxu0 %v5117_v41  ;;  %3813 = vmatmul.mubr.bf16.vlgmr.msra.gmra.mrb[68].mxu1 %v341_v6  ;;  %v368_v41 = vunpack.c.h.s8.bf16 %v6166_v52  ;;  %v346_v6 = vunpack.c.l.s8.bf16 %v306_v3 }
 0x12e   :  { %4637 = vmatprep.subr.bf16.mxu0 %v5119_v47  ;;  %4886 = vmatpush3.bf16.msra.mxu1 %v5240_v8  ;;  %v5151_v47 = vld [vmem:[%s6675_s5 + $0x650] sm:$0xff]   ;;  %v386_v8 = vunpack.c.h.s8.bf16 %v306_v3 }
 0x12f   :  { %3820 = vmatprep.mubr.bf16.mxu1 %v382_v7  ;;  %4887 = vmatprep.subr.bf16.mxu1 %v5242_v11  ;;  %v305_v7 = vld [vmem:[%s6676_s2 + $0x130] sm:$0xff]  ;;  %v5161_v11 = vld [vmem:[%s6675_s5 + $0x620] sm:$0xff]  }
 0x130   :  { %3380 = vmatmul.mubr.bf16.gmra.mrb[40].mxu0 %v363_v56  ;;  %v5199_v3 = vld [vmem:[%s6675_s5 + $0x770] sm:$0xff]  }
 0x131   :  { %4638 = vmatpush3.bf16.msra.mxu0 %v5121_v57  ;;  %3469 = vmatprep.mubr.bf16.mxu0 %v328_v58  ;;  %v5153_v57 = vld [vmem:[%s6675_s5 + $0x610] sm:$0xff]  }
 0x132   :  { %4639 = vmatprep.subr.bf16.mxu0 %v5123_v60  ;;  %4888 = vmatpush3.bf16.msra.mxu1 %v5244_v13  ;;  %v5264_v60 = vld [vmem:[%s6675_s5 + $0x9b0] sm:$0xff]   ;;  %v5165_v13 = vld [vmem:[%s6675_s5 + $0x628] sm:$0xff]  }
 0x133   :  { %4889 = vmatprep.subr.bf16.mxu1 %v5246_v16 }
 0x135   :  { %4640 = vmatpush3.bf16.msra.mxu0 %v5125_v62  ;;  %3821 = vmatmul.mubr.bf16.gmra.mrb[72].mxu1 %v381_v15  ;;  %v5155_v62 = vld [vmem:[%s6675_s5 + $0x658] sm:$0xff]   ;;  %v5167_v15 = vld [vmem:[%s6675_s5 + $0x670] sm:$0xff]  }
 0x136   :  { %4641 = vmatprep.subr.bf16.mxu0 %v5127_v2  ;;  %4890 = vmatpush3.bf16.msra.mxu1 %v5248_v18  ;;  %v5157_v2 = vld [vmem:[%s6675_s5 + $0x618] sm:$0xff]   ;;  %v5169_v18 = vld [vmem:[%s6675_s5 + $0x630] sm:$0xff]  }
 0x137   :  { %4891 = vmatprep.subr.bf16.mxu1 %v5250_v20  ;;  %3910 = vmatprep.mubr.bf16.mxu1 %v346_v6 }
 0x139   :  { %4642 = vmatpush3.bf16.msra.mxu0 %v5129_v4  ;;  %v5159_v4 = vld [vmem:[%s6675_s5 + $0x660] sm:$0xff]  }
 0x13a   :  { %4643 = vmatprep.subr.bf16.mxu0 %v5131_v9  ;;  %4892 = vmatpush3.bf16.msra.mxu1 %v5252_v23  ;;  %v345_v9 = vunpack.c.l.s8.bf16 %v305_v7  ;;  %v291_v23 = vld [vmem:[%s6676_s2 + $0xc0] sm:$0xff] }
 0x13b   :  { %4893 = vmatprep.subr.bf16.mxu1 %v5254_v28  ;;  %v331_v28 = vunpack.c.l.s8.bf16 %v291_v23 }
 0x13d   :  { %4644 = vmatpush3.bf16.msra.mxu0 %v5133_v12  ;;  %v5163_v12 = vld [vmem:[%s6675_s5 + $0x668] sm:$0xff]  }
 0x13e   :  { %4645 = vmatprep.subr.bf16.mxu0 %v5135_v14  ;;  %v4509_v24 = vpop.f32.mrb[20].mxu1  ;;  %4894 = vmatpush3.bf16.msra.mxu1 %v5256_v36  ;;  %v385_v14 = vunpack.c.h.s8.bf16 %v305_v7 }
 0x13f   :  { %v4510_v26 = vpop.f32.mrb[21].mxu1  ;;  %4895 = vmatprep.subr.bf16.mxu1 %v5258_v43  ;;  %v5181_v43 = vld [vmem:[%s6675_s5 + $0x708] sm:$0xff]  }
 0x140   :  { %v6252_v29 = vadd.f32 %v4510_v26, %v4509_v24  ;;  %v4512_v30 = vpop.f32.mrb[22].mxu1  ;;  %v5175_v24 = vld [vmem:[%s6675_s5 + $0x740] sm:$0xff]  }
 0x141   :  { %4646 = vmatpush3.bf16.msra.mxu0 %v5137_v17  ;;  %v4513_v34 = vpop.f32.mrb[23].mxu1 }
 0x142   :  { %4647 = vmatprep.subr.bf16.mxu0 %v5139_v19  ;;  %v6260_v38 = vadd.f32 %v4513_v34, %v4512_v30  ;;  %4896 = vmatpush3.bf16.msra.mxu1 %v5260_v48  ;;  %v5171_v19 = vld [vmem:[%s6675_s5 + $0x678] sm:$0xff]   ;;  %v5177_v34 = vld [vmem:[%s6675_s5 + $0x700] sm:$0xff]  }
 0x143   :  { %4897 = vmatprep.subr.bf16.mxu1 %v5262_v53 }
 0x145   :  { %4648 = vmatpush3.bf16.msra.mxu0 %v5141_v21 }
 0x146   :  { %4689 = vmatprep.subr.bf16.mxu0 %v5143_v25  ;;  %v4515_v49 = vpop.f32.mrb[24].mxu1  ;;  %4898 = vmatpush3.bf16.msra.mxu1 %v5264_v60 }
 0x147   :  { %v4516_v52 = vpop.f32.mrb[25].mxu1  ;;  %4899 = vmatprep.subr.bf16.mxu1 %v5266_v0  ;;  %v5193_v0 = vld [vmem:[%s6675_s5 + $0x720] sm:$0xff]  }
 0x148   :  { %3470 = vmatmul.mubr.bf16.vlgmr.msra.gmra.mrb[44].mxu0 %v327_v35  ;;  %v6286_v54 = vadd.f32 %v4516_v52, %v4515_v49  ;;  %v4518_v56 = vpop.f32.mrb[26].mxu1  ;;  %v372_v35 = vunpack.c.h.s8.bf16 %v6281_v51  ;;  %v371_v51 = vunpack.c.h.s8.bf16 %v291_v23 }
 0x149   :  { %4690 = vmatpush3.bf16.msra.mxu0 %v5145_v31  ;;  %3477 = vmatprep.mubr.bf16.mxu0 %v368_v41  ;;  %v4519_v58 = vpop.f32.mrb[27].mxu1 }
 0x14a   :  { %4691 = vmatprep.subr.bf16.mxu0 %v5147_v40  ;;  %v6294_v61 = vadd.f32 %v4519_v58, %v4518_v56  ;;  %4900 = vmatpush3.bf16.msra.mxu1 %v5268_v1  ;;  %v5179_v40 = vld [vmem:[%s6675_s5 + $0x748] sm:$0xff]   ;;  %v5185_v56 = vld [vmem:[%s6675_s5 + $0x710] sm:$0xff]  }
 0x14b   :  { %v5195_v1 = vld [vmem:[%s6675_s5 + $0x768] sm:$0xff]  }
 0x14d   :  { %4692 = vmatpush3.bf16.msra.mxu0 %v5149_v45  ;;  %3911 = vmatmul.mubr.bf16.vlgmr.msra.gmra.mrb[76].mxu1 %v345_v9  ;;  %v5183_v45 = vld [vmem:[%s6675_s5 + $0x750] sm:$0xff]  }
 0x14e   :  { %4693 = vmatprep.subr.bf16.mxu0 %v5151_v47  ;;  %3918 = vmatprep.mubr.bf16.mxu1 %v386_v8  ;;  %v6373_v47 = vld [vmem:[%s6676_s2 + $0xe8] sm:$0xff]  ;;  %v5201_v9 = vld [vmem:[%s6675_s5 + $0x730] sm:$0xff]  }
 0x150   :  { %3478 = vmatmul.mubr.bf16.gmra.mrb[48].mxu0 %v367_v59  ;;  %v5187_v59 = vld [vmem:[%s6675_s5 + $0x758] sm:$0xff]  }
 0x151   :  { %4694 = vmatpush3.bf16.msra.mxu0 %v5153_v57  ;;  %3567 = vmatprep.mubr.bf16.mxu0 %v332_v63  ;;  %v336_v57 = vunpack.c.l.s8.bf16 %v6373_v47  ;;  %v5191_v63 = vld [vmem:[%s6675_s5 + $0x760] sm:$0xff]  }
 0x152   :  { %4695 = vmatprep.subr.bf16.mxu0 %v5155_v62  ;;  %v5189_v62 = vld [vmem:[%s6675_s5 + $0x718] sm:$0xff]  }
 0x155   :  { %4696 = vmatpush3.bf16.msra.mxu0 %v5157_v2  ;;  %3919 = vmatmul.mubr.bf16.gmra.mrb[80].mxu1 %v385_v14  ;;  %v5197_v2 = vld [vmem:[%s6675_s5 + $0x728] sm:$0xff]  }
 0x156   :  { %4697 = vmatprep.subr.bf16.mxu0 %v5159_v4 }
 0x159   :  { %4698 = vmatpush3.bf16.msra.mxu0 %v5161_v11 }
 0x15a   :  { %4699 = vmatprep.subr.bf16.mxu0 %v5163_v12  ;;  %v5203_v12 = vld [vmem:[%s6675_s5 + $0x778] sm:$0xff]  }
 0x15b   :  { %v6330_v16 = vpop.f32.mrb[0].mxu0 }
 0x15c   :  { %v6332_v17 = vpop.f32.mrb[1].mxu0 }
 0x15d   :  { %4700 = vmatpush3.bf16.msra.mxu0 %v5165_v13 }
 0x15e   :  { %4701 = vmatprep.subr.bf16.mxu0 %v5167_v15  ;;  %v4565_v25 = vpop.f32.mrb[28].mxu1 }
 0x15f   :  { %v6340_v20 = vpop.f32.mrb[2].mxu0  ;;  %v4566_v26 = vpop.f32.mrb[29].mxu1 }
 0x160   :  { %v6342_v21 = vpop.f32.mrb[3].mxu0  ;;  %v6353_v30 = vadd.f32 %v4566_v26, %v4565_v25  ;;  %v4568_v31 = vpop.f32.mrb[30].mxu1  ;;  %v5209_v26 = vld [vmem:[%s6675_s5 + $0x800] sm:$0xff]  }
 0x161   :  { %4702 = vmatpush3.bf16.msra.mxu0 %v5169_v18  ;;  %v4569_v36 = vpop.f32.mrb[31].mxu1  ;;  %v5205_v18 = vld [vmem:[%s6675_s5 + $0x738] sm:$0xff]  }
 0x162   :  { %4703 = vmatprep.subr.bf16.mxu0 %v5171_v19  ;;  %v6362_v41 = vadd.f32 %v4569_v36, %v4568_v31  ;;  %v295_v19 = vld [vmem:[%s6676_s2 + $0xe0] sm:$0xff] }
 0x165   :  { %4704 = vmatpush3.bf16.msra.mxu0 %v5173_v22  ;;  %v5207_v22 = vld [vmem:[%s6675_s5 + $0x840] sm:$0xff]  }
 0x166   :  { %4745 = vmatprep.subr.bf16.mxu0 %v5175_v24  ;;  %v4571_v48 = vpop.f32.mrb[32].mxu1  ;;  %v335_v24 = vunpack.c.l.s8.bf16 %v295_v19 }
 0x167   :  { %v4572_v49 = vpop.f32.mrb[33].mxu1 }
 0x168   :  { %3568 = vmatmul.mubr.bf16.vlgmr.msra.gmra.mrb[52].mxu0 %v331_v28  ;;  %v6375_v52 = vadd.f32 %v4572_v49, %v4571_v48  ;;  %v4574_v53 = vpop.f32.mrb[34].mxu1  ;;  %v376_v28 = vunpack.c.h.s8.bf16 %v6373_v47  ;;  %v5213_v47 = vld [vmem:[%s6675_s5 + $0x808] sm:$0xff]  }
 0x169   :  { %4746 = vmatpush3.bf16.msra.mxu0 %v5177_v34  ;;  %3575 = vmatprep.mubr.bf16.mxu0 %v372_v35  ;;  %v4575_v58 = vpop.f32.mrb[35].mxu1 }
 0x16a   :  { %4747 = vmatprep.subr.bf16.mxu0 %v5179_v40  ;;  %v6384_v60 = vadd.f32 %v4575_v58, %v4574_v53  ;;  %v5211_v40 = vld [vmem:[%s6675_s5 + $0x848] sm:$0xff]   ;;  %v375_v58 = vunpack.c.h.s8.bf16 %v295_v19 }
 0x16d   :  { %4748 = vmatpush3.bf16.msra.mxu0 %v5181_v43 }
 0x16e   :  { %4749 = vmatprep.subr.bf16.mxu0 %v5183_v45 }
 0x170   :  { %3576 = vmatmul.mubr.bf16.gmra.mrb[56].mxu0 %v371_v51 }
 0x171   :  { %4750 = vmatpush3.bf16.msra.mxu0 %v5185_v56  ;;  %3665 = vmatprep.mubr.bf16.mxu0 %v336_v57  ;;  %v5215_v56 = vld [vmem:[%s6675_s5 + $0x850] sm:$0xff]  }
 0x172   :  { %4751 = vmatprep.subr.bf16.mxu0 %v5187_v59 }
 0x175   :  { %4752 = vmatpush3.bf16.msra.mxu0 %v5189_v62  ;;  %v5217_v62 = vld [vmem:[%s6675_s5 + $0x810] sm:$0xff]  }
 0x176   :  { %4753 = vmatprep.subr.bf16.mxu0 %v5191_v63 }
 0x179   :  { %4754 = vmatpush3.bf16.msra.mxu0 %v5193_v0 }
 0x17a   :  { %4755 = vmatprep.subr.bf16.mxu0 %v5195_v1  ;;  %v5219_v1 = vld [vmem:[%s6675_s5 + $0x858] sm:$0xff]  }
 0x17b   :  { %v4369_v4 = vpop.f32.mrb[4].mxu0 }
 0x17c   :  { %v4370_v6 = vpop.f32.mrb[5].mxu0 }
 0x17d   :  { %v4371_v7 = vadd.f32 %v4370_v6, %v4369_v4  ;;  %v4372_v8 = vpop.f32.mrb[6].mxu0  ;;  %4756 = vmatpush3.bf16.msra.mxu0 %v5197_v2  ;;  %v5221_v4 = vld [vmem:[%s6675_s5 + $0x818] sm:$0xff]   ;;  %v5223_v6 = vld [vmem:[%s6675_s5 + $0x860] sm:$0xff]  }
 0x17e   :  { %v4373_v11 = vpop.f32.mrb[7].mxu0  ;;  %4757 = vmatprep.subr.bf16.mxu0 %v5199_v3  ;;  %v4621_v23 = vpop.f32.mrb[36].mxu1 }
 0x17f   :  { %v6411_v13 = vadd.f32 %v6012_v32, %v4371_v7  ;;  %v4374_v14 = vadd.f32 %v4373_v11, %v4372_v8  ;;  %v5225_v7 = vld [vmem:[%s6675_s5 + $0x820] sm:$0xff]   ;;  %v5227_v8 = vld [vmem:[%s6675_s5 + $0x868] sm:$0xff]   ;;  %v5231_v11 = vld [vmem:[%s6675_s5 + $0x870] sm:$0xff]  }
 0x181   :  { %v6414_v15 = vadd.f32 %v6020_v37, %v4374_v14  ;;  %4758 = vmatpush3.bf16.msra.mxu0 %v5201_v9  ;;  %v4622_v37 = vpop.f32.mrb[37].mxu1  ;;  %v5229_v9 = vld [vmem:[%s6675_s5 + $0x828] sm:$0xff]  }
 0x182   :  { %4759 = vmatprep.subr.bf16.mxu0 %v5203_v12  ;;  %v6429_v35 = vadd.f32 %v4622_v37, %v4621_v23  ;;  %v4624_v36 = vpop.f32.mrb[38].mxu1  ;;  %v5235_v23 = vld [vmem:[%s6675_s5 + $0x878] sm:$0xff]  }
 0x183   :  { %v4375_v32 = vpop.f32.mrb[8].mxu0  ;;  %v4625_v45 = vpop.f32.mrb[39].mxu1 }
 0x184   :  { %v4376_v25 = vpop.f32.mrb[9].mxu0  ;;  %v6437_v51 = vadd.f32 %v4625_v45, %v4624_v36  ;;  %v5241_v45 = vld [vmem:[%s6675_s5 + $0x900] sm:$0xff]  }
 0x185   :  { %4760 = vmatpush3.bf16.msra.mxu0 %v5205_v18  ;;  %v4377_v31 = vadd.f32 %v4376_v25, %v4375_v32  ;;  %v4378_v34 = vpop.f32.mrb[10].mxu0 }
 0x186   :  { %4801 = vmatprep.subr.bf16.mxu0 %v5207_v22  ;;  %v4379_v43 = vpop.f32.mrb[11].mxu0  ;;  %v4627_v57 = vpop.f32.mrb[40].mxu1  ;;  %v5233_v22 = vld [vmem:[%s6675_s5 + $0x830] sm:$0xff]  }
 0x187   :  { %v6435_v48 = vadd.f32 %v6080_v5, %v4377_v31  ;;  %v4380_v49 = vadd.f32 %v4379_v43, %v4378_v34  ;;  %v6451_v5 = vld [vmem:[%s6676_s2 + $0x108] sm:$0xff]  ;;  %v4628_v59 = vpop.f32.mrb[41].mxu1  ;;  %v299_v31 = vld [vmem:[%s6676_s2 + $0x100] sm:$0xff] }
 0x188   :  { %3666 = vmatmul.mubr.bf16.vlgmr.msra.gmra.mrb[60].mxu0 %v335_v24  ;;  %v6457_v63 = vadd.f32 %v4628_v59, %v4627_v57  ;;  %v4630_v0 = vpop.f32.mrb[42].mxu1 }
 0x189   :  { %4802 = vmatpush3.bf16.msra.mxu0 %v5209_v26  ;;  %3673 = vmatprep.mubr.bf16.mxu0 %v376_v28  ;;  %v6443_v53 = vadd.f32 %v6088_v10, %v4380_v49  ;;  %v340_v10 = vunpack.c.l.s8.bf16 %v6451_v5  ;;  %v4631_v2 = vpop.f32.mrb[43].mxu1  ;;  %v5237_v28 = vld [vmem:[%s6675_s5 + $0x838] sm:$0xff]   ;;  %v380_v49 = vunpack.c.h.s8.bf16 %v6451_v5 }
 0x18a   :  { %4803 = vmatprep.subr.bf16.mxu0 %v5211_v40  ;;  %v6462_v3 = vadd.f32 %v4631_v2, %v4630_v0  ;;  %v5245_v2 = vld [vmem:[%s6675_s5 + $0x908] sm:$0xff]  }
 0x18d   :  { %4804 = vmatpush3.bf16.msra.mxu0 %v5213_v47 }
 0x18e   :  { %4805 = vmatprep.subr.bf16.mxu0 %v5215_v56 }
 0x190   :  { %3674 = vmatmul.mubr.bf16.gmra.mrb[64].mxu0 %v375_v58 }
 0x191   :  { %4806 = vmatpush3.bf16.msra.mxu0 %v5217_v62  ;;  %3763 = vmatprep.mubr.bf16.mxu0 %v340_v10 }
 0x192   :  { %4807 = vmatprep.subr.bf16.mxu0 %v5219_v1 }
 0x195   :  { %4808 = vmatpush3.bf16.msra.mxu0 %v5221_v4 }
 0x196   :  { %4809 = vmatprep.subr.bf16.mxu0 %v5223_v6  ;;  %v6528_v6 = vld [vmem:[%s6676_s2 + $0x128] sm:$0xff] }
 0x199   :  { %4810 = vmatpush3.bf16.msra.mxu0 %v5225_v7  ;;  %v5249_v7 = vld [vmem:[%s6675_s5 + $0x910] sm:$0xff]  }
 0x19a   :  { %4811 = vmatprep.subr.bf16.mxu0 %v5227_v8  ;;  %v344_v8 = vunpack.c.l.s8.bf16 %v6528_v6 }
 0x19b   :  { %v4425_v12 = vpop.f32.mrb[12].mxu0 }
 0x19c   :  { %v4426_v14 = vpop.f32.mrb[13].mxu0 }
 0x19d   :  { %v4427_v18 = vadd.f32 %v4426_v14, %v4425_v12  ;;  %v4428_v19 = vpop.f32.mrb[14].mxu0  ;;  %4812 = vmatpush3.bf16.msra.mxu0 %v5229_v9 }
 0x19e   :  { %v4429_v32 = vpop.f32.mrb[15].mxu0  ;;  %4813 = vmatprep.subr.bf16.mxu0 %v5231_v11  ;;  %v4677_v47 = vpop.f32.mrb[44].mxu1  ;;  %v5251_v11 = vld [vmem:[%s6675_s5 + $0x958] sm:$0xff]  }
 0x19f   :  { %v3080_v24 = vadd.f32 %v4427_v18, %v6411_v13  ;;  %v4430_v25 = vadd.f32 %v4429_v32, %v4428_v19  ;;  %v5239_v13 = vld [vmem:[%s6675_s5 + $0x940] sm:$0xff]   ;;  %v4678_v57 = vpop.f32.mrb[45].mxu1  ;;  %v5253_v19 = vld [vmem:[%s6675_s5 + $0x918] sm:$0xff]  }
 0x1a0   :  { %v6513_v62 = vadd.f32 %v4678_v57, %v4677_v47  ;;  %v4680_v10 = vpop.f32.mrb[46].mxu1  ;;  %v5255_v32 = vld [vmem:[%s6675_s5 + $0x960] sm:$0xff]  }
 0x1a1   :  { %v6490_v37 = vadd.f32 %v6129_v27, %v3080_v24  ;;  %v3083_v26 = vadd.f32 %v4430_v25, %v6414_v15  ;;  %4814 = vmatpush3.bf16.msra.mxu0 %v5233_v22  ;;  %v339_v15 = vunpack.c.l.s8.bf16 %v299_v31  ;;  %v4681_v0 = vpop.f32.mrb[47].mxu1  ;;  %v5259_v24 = vld [vmem:[%s6675_s5 + $0x968] sm:$0xff]  }
 0x1a2   :  { %4815 = vmatprep.subr.bf16.mxu0 %v5235_v23  ;;  %v6520_v4 = vadd.f32 %v4681_v0, %v4680_v10  ;;  %v5257_v23 = vld [vmem:[%s6675_s5 + $0x920] sm:$0xff]   ;;  %v5261_v25 = vld [vmem:[%s6675_s5 + $0x928] sm:$0xff]  }
 0x1a3   :  { %v6503_v34 = vadd.f32 %v6137_v33, %v3083_v26  ;;  %v4431_v27 = vpop.f32.mrb[16].mxu0  ;;  %v5243_v33 = vld [vmem:[%s6675_s5 + $0x948] sm:$0xff]   ;;  %v5263_v26 = vld [vmem:[%s6675_s5 + $0x970] sm:$0xff]  }
 0x1a4   :  { %v4432_v36 = vpop.f32.mrb[17].mxu0 }
 0x1a5   :  { %v4433_v40 = vadd.f32 %v4432_v36, %v4431_v27  ;;  %v4434_v43 = vpop.f32.mrb[18].mxu0  ;;  %4816 = vmatpush3.bf16.msra.mxu0 %v5237_v28  ;;  %v5265_v36 = vld [vmem:[%s6675_s5 + $0x930] sm:$0xff]  }
 0x1a6   :  { %v4435_v56 = vpop.f32.mrb[19].mxu0  ;;  %4857 = vmatprep.subr.bf16.mxu0 %v5239_v13  ;;  %v4683_v9 = vpop.f32.mrb[48].mxu1 }
 0x1a7   :  { %v3088_v58 = vadd.f32 %v4433_v40, %v6435_v48  ;;  %v4436_v59 = vadd.f32 %v4435_v56, %v4434_v43  ;;  %v5247_v48 = vld [vmem:[%s6675_s5 + $0x950] sm:$0xff]   ;;  %v4684_v12 = vpop.f32.mrb[49].mxu1  ;;  %v5267_v40 = vld [vmem:[%s6675_s5 + $0x978] sm:$0xff]  }
 0x1a8   :  { %3764 = vmatmul.mubr.bf16.vlgmr.msra.gmra.mrb[68].mxu0 %v339_v15  ;;  %v6538_v14 = vadd.f32 %v4684_v12, %v4683_v9  ;;  %v4686_v18 = vpop.f32.mrb[50].mxu1  ;;  %v5269_v56 = vld [vmem:[%s6675_s5 + $0x938] sm:$0xff]   ;;  %s5292_s5 = smov 64  }
 0x1a9   :  { %v3091_v1 = vadd.f32 %v4436_v59, %v6443_v53  ;;  %v3137_v5 = vadd.f32 %v6161_v50, %v3088_v58  ;;  %4858 = vmatpush3.bf16.msra.mxu0 %v5241_v45  ;;  %3771 = vmatprep.mubr.bf16.mxu0 %v380_v49  ;;  %v379_v53 = vunpack.c.h.s8.bf16 %v299_v31 }
 0x1aa   :  { %4859 = vmatprep.subr.bf16.mxu0 %v5243_v33  ;;  %v303_v33 = vld [vmem:[%s6676_s2 + $0x120] sm:$0xff]  ;;  %s5291_s2 = smov 32  }
 0x1ab   :  { %v3140_v50 = vadd.f32 %v6171_v55, %v3091_v1  ;;  %v4687_v55 = vpop.f32.mrb[51].mxu1 }
 0x1ac   :  { %v6543_v22 = vadd.f32 %v4687_v55, %v4686_v18  ;;  %v383_v55 = vunpack.c.h.s8.bf16 %v303_v33 }
 0x1ad   :  { %4860 = vmatpush3.bf16.msra.mxu0 %v5245_v2 }
 0x1ae   :  { %4861 = vmatprep.subr.bf16.mxu0 %v5247_v48 }
 0x1b0   :  { %3772 = vmatmul.mubr.bf16.gmra.mrb[72].mxu0 %v379_v53 }
 0x1b1   :  { %4862 = vmatpush3.bf16.msra.mxu0 %v5249_v7  ;;  %3861 = vmatprep.mubr.bf16.mxu0 %v344_v8 }
 0x1b2   :  { %4863 = vmatprep.subr.bf16.mxu0 %v5251_v11 }
 0x1b5   :  { %4864 = vmatpush3.bf16.msra.mxu0 %v5253_v19 }
 0x1b6   :  { %4865 = vmatprep.subr.bf16.mxu0 %v5255_v32 }
 0x1b9   :  { %4866 = vmatpush3.bf16.msra.mxu0 %v5257_v23 }
 0x1ba   :  { %4867 = vmatprep.subr.bf16.mxu0 %v5259_v24 }
 0x1bb   :  { %v4481_v28 = vpop.f32.mrb[20].mxu0 }
 0x1bc   :  { %v4482_v31 = vpop.f32.mrb[21].mxu0 }
 0x1bd   :  { %v4483_v13 = vadd.f32 %v4482_v31, %v4481_v28  ;;  %v4484_v27 = vpop.f32.mrb[22].mxu0  ;;  %4868 = vmatpush3.bf16.msra.mxu0 %v5261_v25 }
 0x1be   :  { %v4485_v15 = vpop.f32.mrb[23].mxu0  ;;  %4869 = vmatprep.subr.bf16.mxu0 %v5263_v26 }
 0x1bf   :  { %v3178_v43 = vadd.f32 %v4483_v13, %v6490_v37  ;;  %v4486_v45 = vadd.f32 %v4485_v15, %v4484_v27  ;;  %v343_v37 = vunpack.c.l.s8.bf16 %v303_v33  ;;  %v4733_v1 = vpop.f32.mrb[52].mxu1 }
 0x1c0   :  { %v4734_v53 = vpop.f32.mrb[53].mxu1 }
 0x1c1   :  { %v3227_v49 = vadd.f32 %v6252_v29, %v3178_v43  ;;  %v3181_v47 = vadd.f32 %v4486_v45, %v6503_v34  ;;  %4870 = vmatpush3.bf16.msra.mxu0 %v5265_v36  ;;  %v384_v29 = vunpack.c.h.s8.bf16 %v6528_v6  ;;  %v6577_v7 = vadd.f32 %v4734_v53, %v4733_v1  ;;  %v4736_v8 = vpop.f32.mrb[54].mxu1 }
 0x1c2   :  { %4871 = vmatprep.subr.bf16.mxu0 %v5267_v40  ;;  %v4737_v11 = vpop.f32.mrb[55].mxu1 }
 0x1c3   :  { %v3230_v57 = vadd.f32 %v6260_v38, %v3181_v47  ;;  %v4487_v58 = vpop.f32.mrb[24].mxu0  ;;  %v6580_v12 = vadd.f32 %v4737_v11, %v4736_v8 }
 0x1c4   :  { %v4488_v59 = vpop.f32.mrb[25].mxu0 }
 0x1c5   :  { %v4489_v10 = vadd.f32 %v4488_v59, %v4487_v58  ;;  %v4490_v0 = vpop.f32.mrb[26].mxu0  ;;  %4872 = vmatpush3.bf16.msra.mxu0 %v5269_v56 }
 0x1c6   :  { %v4491_v34 = vpop.f32.mrb[27].mxu0 }
 0x1c7   :  { %v3186_v2 = vadd.f32 %v4489_v10, %v3137_v5  ;;  %v4492_v48 = vadd.f32 %v4491_v34, %v4490_v0  ;;  %v4739_v6 = vpop.f32.mrb[56].mxu1 }
 0x1c8   :  { %3862 = vmatmul.mubr.bf16.vlgmr.msra.gmra.mrb[76].mxu0 %v343_v37  ;;  %v4740_v19 = vpop.f32.mrb[57].mxu1 }
 0x1c9   :  { %v3189_v9 = vadd.f32 %v4492_v48, %v3140_v50  ;;  %v3235_v38 = vadd.f32 %v6286_v54, %v3186_v2  ;;  %3869 = vmatprep.mubr.bf16.mxu0 %v384_v29  ;;  %v6583_v5 = vadd.f32 %v4740_v19, %v4739_v6  ;;  %v4742_v32 = vpop.f32.mrb[58].mxu1 }
 0x1ca   :  { %v4743_v23 = vpop.f32.mrb[59].mxu1 }
 0x1cb   :  { %v3238_v18 = vadd.f32 %v6294_v61, %v3189_v9  ;;  %v6585_v24 = vadd.f32 %v4743_v23, %v4742_v32 }
 0x1d0   :  { %3870 = vmatmul.mubr.bf16.gmra.mrb[80].mxu0 %v383_v55 }
 0x1db   :  { %v4537_v25 = vpop.f32.mrb[28].mxu0 }
 0x1dc   :  { %v4538_v50 = vpop.f32.mrb[29].mxu0 }
 0x1dd   :  { %v4539_v26 = vadd.f32 %v4538_v50, %v4537_v25  ;;  %v4540_v54 = vpop.f32.mrb[30].mxu0 }
 0x1de   :  { %v4541_v28 = vpop.f32.mrb[31].mxu0 }
 0x1df   :  { %v3276_v31 = vadd.f32 %v4539_v26, %v3227_v49  ;;  %v4542_v13 = vadd.f32 %v4541_v28, %v4540_v54 }
 0x1e0   :  { %v4789_v58 = vpop.f32.mrb[60].mxu1 }
 0x1e1   :  { %v3325_v27 = vadd.f32 %v6353_v30, %v3276_v31  ;;  %v3279_v61 = vadd.f32 %v4542_v13, %v3230_v57  ;;  %v4790_v59 = vpop.f32.mrb[61].mxu1 }
 0x1e2   :  { %v6590_v0 = vadd.f32 %v4790_v59, %v4789_v58  ;;  %v4792_v49 = vpop.f32.mrb[62].mxu1 }
 0x1e3   :  { %v3328_v36 = vadd.f32 %v6362_v41, %v3279_v61  ;;  %v4543_v15 = vpop.f32.mrb[32].mxu0  ;;  %v4793_v29 = vpop.f32.mrb[63].mxu1 }
 0x1e4   :  { %v4544_v40 = vpop.f32.mrb[33].mxu0  ;;  %v6593_v57 = vadd.f32 %v4793_v29, %v4792_v49 }
 0x1e5   :  { %v4545_v43 = vadd.f32 %v4544_v40, %v4543_v15  ;;  %v4546_v45 = vpop.f32.mrb[34].mxu0 }
 0x1e6   :  { %v4547_v47 = vpop.f32.mrb[35].mxu0 }
 0x1e7   :  { %v3284_v56 = vadd.f32 %v4545_v43, %v3235_v38  ;;  %v4548_v33 = vadd.f32 %v4547_v47, %v4546_v45 }
 0x1e8   :  { %v4795_v41 = vpop.f32.mrb[64].mxu1 }
 0x1e9   :  { %v3287_v37 = vadd.f32 %v4548_v33, %v3238_v18  ;;  %v3333_v10 = vadd.f32 %v6375_v52, %v3284_v56  ;;  %v4796_v34 = vpop.f32.mrb[65].mxu1 }
 0x1ea   :  { %v6595_v1 = vadd.f32 %v4796_v34, %v4795_v41  ;;  %v4798_v2 = vpop.f32.mrb[66].mxu1 }
 0x1eb   :  { %v3336_v30 = vadd.f32 %v6384_v60, %v3287_v37  ;;  %v4799_v48 = vpop.f32.mrb[67].mxu1 }
 0x1ec   :  { %v6597_v53 = vadd.f32 %v4799_v48, %v4798_v2 }
 0x1fb   :  { %v4593_v8 = vpop.f32.mrb[36].mxu0 }
 0x1fc   :  { %v4594_v9 = vpop.f32.mrb[37].mxu0 }
 0x1fd   :  { %v4595_v38 = vadd.f32 %v4594_v9, %v4593_v8  ;;  %v4596_v52 = vpop.f32.mrb[38].mxu0 }
 0x1fe   :  { %v4597_v11 = vpop.f32.mrb[39].mxu0 }
 0x1ff   :  { %v3374_v18 = vadd.f32 %v4595_v38, %v3325_v27  ;;  %v4598_v55 = vadd.f32 %v4597_v11, %v4596_v52 }
 0x200   :  { %v4845_v31 = vpop.f32.mrb[68].mxu1 }
 0x201   :  { %v3423_v6 = vadd.f32 %v6429_v35, %v3374_v18  ;;  %v3377_v60 = vadd.f32 %v4598_v55, %v3328_v36  ;;  %v4846_v15 = vpop.f32.mrb[69].mxu1 }
 0x202   :  { %v6602_v40 = vadd.f32 %v4846_v15, %v4845_v31  ;;  %v4848_v27 = vpop.f32.mrb[70].mxu1 }
 0x203   :  { %v3426_v19 = vadd.f32 %v6437_v51, %v3377_v60  ;;  %v4599_v32 = vpop.f32.mrb[40].mxu0  ;;  %v4849_v36 = vpop.f32.mrb[71].mxu1 }
 0x204   :  { %v4600_v23 = vpop.f32.mrb[41].mxu0  ;;  %v6605_v43 = vadd.f32 %v4849_v36, %v4848_v27 }
 0x205   :  { %v4601_v25 = vadd.f32 %v4600_v23, %v4599_v32  ;;  %v4602_v50 = vpop.f32.mrb[42].mxu0 }
 0x206   :  { %v4603_v26 = vpop.f32.mrb[43].mxu0 }
 0x207   :  { %v3382_v54 = vadd.f32 %v4601_v25, %v3333_v10  ;;  %v4604_v28 = vadd.f32 %v4603_v26, %v4602_v50 }
 0x208   :  { %v4851_v51 = vpop.f32.mrb[72].mxu1 }
 0x209   :  { %v3385_v13 = vadd.f32 %v4604_v28, %v3336_v30  ;;  %v3431_v61 = vadd.f32 %v6457_v63, %v3382_v54  ;;  %v4852_v45 = vpop.f32.mrb[73].mxu1 }
 0x20a   :  { %v6607_v47 = vadd.f32 %v4852_v45, %v4851_v51  ;;  %v4854_v56 = vpop.f32.mrb[74].mxu1 }
 0x20b   :  { %v3434_v35 = vadd.f32 %v6462_v3, %v3385_v13  ;;  %v4855_v33 = vpop.f32.mrb[75].mxu1 }
 0x20c   :  { %v6609_v58 = vadd.f32 %v4855_v33, %v4854_v56 }
 0x21b   :  { %v4649_v59 = vpop.f32.mrb[44].mxu0 }
 0x21c   :  { %v4650_v37 = vpop.f32.mrb[45].mxu0 }
 0x21d   :  { %v4651_v63 = vadd.f32 %v4650_v37, %v4649_v59  ;;  %v4652_v10 = vpop.f32.mrb[46].mxu0 }
 0x21e   :  { %v4653_v49 = vpop.f32.mrb[47].mxu0 }
 0x21f   :  { %v3472_v29 = vadd.f32 %v4651_v63, %v3423_v6  ;;  %v4654_v30 = vadd.f32 %v4653_v49, %v4652_v10 }
 0x220   :  { %v4901_v18 = vpop.f32.mrb[76].mxu1 }
 0x221   :  { %v3521_v3 = vadd.f32 %v6513_v62, %v3472_v29  ;;  %v3475_v41 = vadd.f32 %v4654_v30, %v3426_v19  ;;  %v4902_v32 = vpop.f32.mrb[77].mxu1 }
 0x222   :  { %v6614_v23 = vadd.f32 %v4902_v32, %v4901_v18  ;;  %v4904_v6 = vpop.f32.mrb[78].mxu1 }
 0x223   :  { %v3524_v34 = vadd.f32 %v6520_v4, %v3475_v41  ;;  %v4655_v2 = vpop.f32.mrb[48].mxu0  ;;  %v4905_v19 = vpop.f32.mrb[79].mxu1 }
 0x224   :  { %v4656_v48 = vpop.f32.mrb[49].mxu0  ;;  %v6617_v25 = vadd.f32 %v4905_v19, %v4904_v6 }
 0x225   :  { %v4657_v8 = vadd.f32 %v4656_v48, %v4655_v2  ;;  %v4658_v9 = vpop.f32.mrb[50].mxu0 }
 0x226   :  { %v4659_v38 = vpop.f32.mrb[51].mxu0 }
 0x227   :  { %v3480_v52 = vadd.f32 %v4657_v8, %v3431_v61  ;;  %v4660_v11 = vadd.f32 %v4659_v38, %v4658_v9 }
 0x228   :  { %v4907_v4 = vpop.f32.mrb[80].mxu1 }
 0x229   :  { %v3483_v55 = vadd.f32 %v4660_v11, %v3434_v35  ;;  %v3529_v60 = vadd.f32 %v6538_v14, %v3480_v52  ;;  %v4908_v50 = vpop.f32.mrb[81].mxu1 }
 0x22a   :  { %v6619_v26 = vadd.f32 %v4908_v50, %v4907_v4  ;;  %v4910_v54 = vpop.f32.mrb[82].mxu1 }
 0x22b   :  { %v3532_v62 = vadd.f32 %v6543_v22, %v3483_v55  ;;  %v4911_v28 = vpop.f32.mrb[83].mxu1 }
 0x22c   :  { %v6621_v31 = vadd.f32 %v4911_v28, %v4910_v54 }
 0x23b   :  { %v4705_v13 = vpop.f32.mrb[52].mxu0 }
 0x23c   :  { %v4706_v61 = vpop.f32.mrb[53].mxu0 }
 0x23d   :  { %v4707_v14 = vadd.f32 %v4706_v61, %v4705_v13  ;;  %v4708_v15 = vpop.f32.mrb[54].mxu0 }
 0x23e   :  { %v4709_v27 = vpop.f32.mrb[55].mxu0 }
 0x23f   :  { %v3570_v35 = vadd.f32 %v4707_v14, %v3521_v3  ;;  %v4710_v36 = vadd.f32 %v4709_v27, %v4708_v15 }
 0x241   :  { %v3619_v22 = vadd.f32 %v6577_v7, %v3570_v35  ;;  %v3573_v51 = vadd.f32 %v4710_v36, %v3524_v34 }
 0x243   :  { %v3622_v45 = vadd.f32 %v6580_v12, %v3573_v51  ;;  %v4711_v56 = vpop.f32.mrb[56].mxu0 }
 0x244   :  { %v4712_v33 = vpop.f32.mrb[57].mxu0 }
 0x245   :  { %v4713_v59 = vadd.f32 %v4712_v33, %v4711_v56  ;;  %v4714_v37 = vpop.f32.mrb[58].mxu0 }
 0x246   :  { %v4715_v63 = vpop.f32.mrb[59].mxu0 }
 0x247   :  { %v3578_v10 = vadd.f32 %v4713_v59, %v3529_v60  ;;  %v4716_v49 = vadd.f32 %v4715_v63, %v4714_v37 }
 0x249   :  { %v3581_v29 = vadd.f32 %v4716_v49, %v3532_v62  ;;  %v3627_v30 = vadd.f32 %v6583_v5, %v3578_v10 }
 0x24b   :  { %v3630_v41 = vadd.f32 %v6585_v24, %v3581_v29 }
 0x25b   :  { %v4761_v2 = vpop.f32.mrb[60].mxu0 }
 0x25c   :  { %v4762_v3 = vpop.f32.mrb[61].mxu0 }
 0x25d   :  { %v4763_v48 = vadd.f32 %v4762_v3, %v4761_v2  ;;  %v4764_v8 = vpop.f32.mrb[62].mxu0 }
 0x25e   :  { %v4765_v7 = vpop.f32.mrb[63].mxu0 }
 0x25f   :  { %v3668_v34 = vadd.f32 %v4763_v48, %v3619_v22  ;;  %v4766_v9 = vadd.f32 %v4765_v7, %v4764_v8 }
 0x261   :  { %v3717_v12 = vadd.f32 %v6590_v0, %v3668_v34  ;;  %v3671_v38 = vadd.f32 %v4766_v9, %v3622_v45 }
 0x263   :  { %v3720_v52 = vadd.f32 %v6593_v57, %v3671_v38  ;;  %v4767_v11 = vpop.f32.mrb[64].mxu0 }
 0x264   :  { %v4768_v18 = vpop.f32.mrb[65].mxu0 }
 0x265   :  { %v4769_v55 = vadd.f32 %v4768_v18, %v4767_v11  ;;  %v4770_v60 = vpop.f32.mrb[66].mxu0  ;;  %v246_v11 = vpop.permute.xlu0 %245 }
 0x266   :  { %v4771_v32 = vpop.f32.mrb[67].mxu0 }
 0x267   :  { %v3676_v5 = vadd.f32 %v4769_v55, %v3627_v30  ;;  %v4772_v6 = vadd.f32 %v4771_v32, %v4770_v60  ;;  %v263_v60 = vmul.f32 %v246_v11, %v5888_v42 }
 0x269   :  { %v3679_v24 = vadd.f32 %v4772_v6, %v3630_v41  ;;  %v3725_v62 = vadd.f32 %v6595_v1, %v3676_v5  ;;  %v261_v32 = vpop.permute.xlu0 %260 }
 0x26a   :  { %v266_v5 = vmul.f32 %v5894_v44, %v261_v32 }
 0x26b   :  { %v3728_v19 = vadd.f32 %v6597_v53, %v3679_v24 }
 0x27b   :  { %v4817_v4 = vpop.f32.mrb[68].mxu0 }
 0x27c   :  { %v4818_v50 = vpop.f32.mrb[69].mxu0 }
 0x27d   :  { %v4819_v54 = vadd.f32 %v4818_v50, %v4817_v4  ;;  %v4820_v28 = vpop.f32.mrb[70].mxu0 }
 0x27e   :  { %v4821_v0 = vpop.f32.mrb[71].mxu0 }
 0x27f   :  { %v3766_v13 = vadd.f32 %v4819_v54, %v3717_v12  ;;  %v4822_v61 = vadd.f32 %v4821_v0, %v4820_v28 }
 0x281   :  { %v3815_v57 = vadd.f32 %v6602_v40, %v3766_v13  ;;  %v3769_v14 = vadd.f32 %v4822_v61, %v3720_v52 }
 0x283   :  { %v3818_v15 = vadd.f32 %v6605_v43, %v3769_v14  ;;  %v4823_v27 = vpop.f32.mrb[72].mxu0 }
 0x284   :  { %v4824_v35 = vpop.f32.mrb[73].mxu0 }
 0x285   :  { %v4825_v36 = vadd.f32 %v4824_v35, %v4823_v27  ;;  %v4826_v22 = vpop.f32.mrb[74].mxu0 }
 0x286   :  { %v4827_v51 = vpop.f32.mrb[75].mxu0 }
 0x287   :  { %v3774_v1 = vadd.f32 %v4825_v36, %v3725_v62  ;;  %v4828_v45 = vadd.f32 %v4827_v51, %v4826_v22 }
 0x289   :  { %v3777_v53 = vadd.f32 %v4828_v45, %v3728_v19  ;;  %v3823_v56 = vadd.f32 %v6607_v47, %v3774_v1 }
 0x28b   :  { %v3826_v33 = vadd.f32 %v6609_v58, %v3777_v53 }
 0x29b   :  { %v4873_v59 = vpop.f32.mrb[76].mxu0 }
 0x29c   :  { %v4874_v37 = vpop.f32.mrb[77].mxu0 }
 0x29d   :  { %v4875_v63 = vadd.f32 %v4874_v37, %v4873_v59  ;;  %v4876_v10 = vpop.f32.mrb[78].mxu0 }
 0x29e   :  { %v4877_v40 = vpop.f32.mrb[79].mxu0 }
 0x29f   :  { %v3864_v49 = vadd.f32 %v4875_v63, %v3815_v57  ;;  %v4878_v29 = vadd.f32 %v4877_v40, %v4876_v10 }
 0x2a1   :  { %v3913_v43 = vadd.f32 %v6614_v23, %v3864_v49  ;;  %v3867_v30 = vadd.f32 %v4878_v29, %v3818_v15 }
 0x2a3   :  { %5278 = vrcp.f32 %v3913_v43  ;;  %v3916_v41 = vadd.f32 %v6617_v25, %v3867_v30  ;;  %v4879_v2 = vpop.f32.mrb[80].mxu0  ;;  %v256_v25 = vpop.permute.xlu1 %255 }
 0x2a4   :  { %v4880_v3 = vpop.f32.mrb[81].mxu0 }
 0x2a5   :  { %5280 = vrcp.f32 %v3916_v41  ;;  %v4881_v48 = vadd.f32 %v4880_v3, %v4879_v2  ;;  %v4882_v47 = vpop.f32.mrb[82].mxu0 }
 0x2a6   :  { %v4883_v8 = vpop.f32.mrb[83].mxu0 }
 0x2a7   :  { %v3872_v58 = vadd.f32 %v4881_v48, %v3823_v56  ;;  %v4884_v7 = vadd.f32 %v4883_v8, %v4882_v47  ;;  %v251_v55 = vpop.permute.xlu1 %250 }
 0x2a9   :  { %v3921_v34 = vadd.f32 %v6619_v26, %v3872_v58  ;;  %v3875_v9 = vadd.f32 %v4884_v7, %v3826_v33  ;;  %v264_v26 = vmul.f32 %v251_v55, %v5900_v46 }
 0x2ab   :  { %5282 = vrcp.f32 %v3921_v34  ;;  %v3924_v12 = vadd.f32 %v6621_v31, %v3875_v9  ;;  %v265_v31 = vmul.f32 %v5879_v39, %v256_v25 }
 0x2ad   :  { %v5279_v38 = vpop.eup %5278  ;;  %5284 = vrcp.f32 %v3924_v12 }
 0x2ae   :  { %3933 = vperm.xlu1 %4946, %v5279_v38  }
 0x2af   :  { %v5281_v23 = vpop.eup %5280 }
 0x2b0   :  { %3938 = vperm.xlu0 %4947, %v5281_v23  }
 0x2b5   :  { %v5283_v52 = vpop.eup %5282 }
 0x2b6   :  { %3943 = vperm.xlu1 %4946, %v5283_v52  }
 0x2b7   :  { %v5285_v18 = vpop.eup %5284 }
 0x2b8   :  { %3948 = vperm.xlu0 %4947, %v5285_v18  }
 0x2ba   :  { %3959 = vrot.lane.b32.xlu1 %v263_v60, %s5291_s2 }
 0x2bc   :  { %3961 = vrot.lane.b32.xlu0 %v264_v26, %s5291_s2 }
 0x2be   :  { %3963 = vrot.lane.b32.xlu1 %v265_v31, %s5291_s2 }
 0x2c0   :  { %3965 = vrot.lane.b32.xlu0 %v266_v5, %s5291_s2 }
 0x32d   :  { %v3934_v6 = vpop.permute.xlu1 %3933 }
 0x32e   :  { %v3951_v24 = vmul.f32 %v3934_v6, %v3913_v43 }
 0x32f   :  { %v3939_v62 = vpop.permute.xlu0 %3938 }
 0x330   :  { %v3952_v19 = vmul.f32 %v3939_v62, %v3916_v41  ;;  %3975 = vrot.lane.b32.xlu1 %v3951_v24, %s5292_s5 }
 0x332   :  { %3977 = vrot.lane.b32.xlu0 %v3952_v19, %s5292_s5 }
 0x335   :  { %v3944_v42 = vpop.permute.xlu1 %3943 }
 0x336   :  { %v3953_v4 = vmul.f32 %v3944_v42, %v3921_v34 }
 0x337   :  { %v3949_v46 = vpop.permute.xlu0 %3948 }
 0x338   :  { %v3954_v50 = vmul.f32 %v3949_v46, %v3924_v12  ;;  %3979 = vrot.lane.b32.xlu1 %v3953_v4, %s5292_s5 }
 0x339   :  { %v3960_v54 = vpop.permute.xlu1 %3959 }
 0x33a   :  { %3981 = vrot.lane.b32.xlu0 %v3954_v50, %s5292_s5  ;;  %v3988_v0 = vsel %vm3987_vm11, %v6332_v17, %v3960_v54 }
 0x33b   :  { %v3962_v39 = vpop.permute.xlu0 %3961 }
 0x33c   :  { %v3989_v57 = vsel %vm3987_vm11, %v6330_v16, %v3962_v39 }
 0x33d   :  { %v3964_v28 = vpop.permute.xlu1 %3963 }
 0x33e   :  { %v3990_v17 = vsel %vm3987_vm11, %v6342_v21, %v3964_v28 }
 0x33f   :  { %v3966_v44 = vpop.permute.xlu0 %3965 }
 0x340   :  { %v3991_v22 = vsel %vm3987_vm11, %v6340_v20, %v3966_v44 }
 0x3a2   :  { %v3976_v13 = vpop.permute.xlu1 %3975 }
 0x3a3   :  { %v3993_v61 = vsel %vm3992_vm12, %v3988_v0, %v3976_v13 }
 0x3a4   :  { %v3998_v14 = vsel %vm3997_vm13, %v3993_v61, 0.0  ;;  %v3978_v15 = vpop.permute.xlu0 %3977 }
 0x3a5   :  { %4002 = vst [vmem:[%s6677_s6] sm:$0xff] %v3998_v14  ;;  %v3994_v27 = vsel %vm3992_vm12, %v3989_v57, %v3978_v15 }
 0x3a6   :  { %v3999_v35 = vsel %vm3997_vm13, %v3994_v27, 0.0 }
 0x3a7   :  { %4003 = vst [vmem:[%s6677_s6 + $0x8] sm:$0xff] %v3999_v35 }
 0x3aa   :  { %v3980_v36 = vpop.permute.xlu1 %3979 }
 0x3ab   :  { %v3995_v16 = vsel %vm3992_vm12, %v3990_v17, %v3980_v36 }
 0x3ac   :  { %v4000_v51 = vsel %vm3997_vm13, %v3995_v16, 0.0  ;;  %v3982_v1 = vpop.permute.xlu0 %3981 }
 0x3ad   :  { %4004 = vst [vmem:[%s6677_s6 + $0x10] sm:$0xff] %v4000_v51  ;;  %v3996_v45 = vsel %vm3992_vm12, %v3991_v22, %v3982_v1 }
 0x3ae   :  { %v4001_v53 = vsel %vm3997_vm13, %v3996_v45, 0.0 }
 0x3af   :  { %4005 = vst [vmem:[%s6677_s6 + $0x18] sm:$0xff] %v4001_v53 }

</bundles_post_ra>
